<compile_context>
chip_gen: v6e
topology: v6e:2x2x1
jax: 0.10.0
libtpu: 0.0.40
codegen_flags: <defaults>
</compile_context>

<pallas_src>
import jax
import jax.numpy as jnp
from jax import lax
from jax.experimental import pallas as pl
from jax.experimental.pallas import tpu as pltpu

_LANES = 128
_DIMS = (8, 6, 4, 2, 1)          # feature widths through the MLP
_CHUNK = 16                      # sublanes per inner chunk (2 vregs / plane)
_ROW_QUANTUM = _CHUNK * _LANES   # 2048-row granularity for blocks / padding
_PREF_BLOCK_ROWS = 262144        # ~8 MiB input block; ~18 MiB pipelined VMEM


def _param_layout():
    """Flat-parameter offsets: per layer, weights (in*out, in-major row-major)
    followed by biases (out)."""
    offs, off = [], 0
    for li in range(len(_DIMS) - 1):
        fin, fout = _DIMS[li], _DIMS[li + 1]
        offs.append((off, off + fin * fout))
        off += fin * fout + fout
    return tuple(offs), off


_OFFS, _NPARAMS = _param_layout()        # _NPARAMS == 95


def _mlp_kernel(x_ref, p_ref, o_ref):
    """x_ref: (8, R, 128) f32 VMEM block (feature-major, rows on lanes).
    p_ref:  (_NPARAMS,) f32 SMEM -- tanh-folded weights/biases.
    o_ref:  (R, 128) f32 VMEM output block (lane-dense stores)."""
    # Hoist every SMEM scalar load out of the chunk loop (one sld each per
    # grid step; inside the loop they are loop-invariant splat operands).
    w = [p_ref[i] for i in range(_NPARAMS)]

    r_total = x_ref.shape[1]
    n_chunks = r_total // _CHUNK

    def chunk_body(c, carry):
        r0 = pl.multiple_of(c * _CHUNK, _CHUNK)
        # 8 feature planes of (16, 128): live set ~30 vregs -> no spills even
        # for very large blocks (review item 2).
        h = [x_ref[k, pl.ds(r0, _CHUNK), :] for k in range(_DIMS[0])]
        for li in range(len(_DIMS) - 1):
            fin, fout = _DIMS[li], _DIMS[li + 1]
            w_off, b_off = _OFFS[li]
            new_h = []
            for j in range(fout):
                acc = h[0] * w[w_off + j] + w[b_off + j]
                for k in range(1, fin):
                    acc = acc + h[k] * w[w_off + k * fout + j]
                # sigmoid folded into weights: a single EUP tanh per unit.
                new_h.append(jnp.tanh(acc))
            h = new_h
        # Undo the final tanh<->sigmoid affine: sigmoid(a) = 0.5*tanh(a/2)+0.5
        o_ref[pl.ds(r0, _CHUNK), :] = h[0] * 0.5 + 0.5
        return carry

    # Partial unroll: LLO scheduler visibility without exploding compile time
    # for large blocks.
    unroll = 1
    for u in (8, 4, 2):
        if n_chunks % u == 0:
            unroll = u
            break
    lax.fori_loop(0, n_chunks, chunk_body, 0, unroll=unroll)


def _fold_params_for_tanh(params):
    """Rewrite (W, b) so each layer is t = tanh(t_prev @ W' + b') with the
    sigmoid(a) = 0.5*tanh(a/2) + 0.5 affine folded into the next layer's
    weights; only the final 0.5*t + 0.5 is applied in the kernel."""
    folded = []
    for li, (w, b) in enumerate(params):
        w = jnp.asarray(w, jnp.float32)
        b = jnp.asarray(b, jnp.float32)
        if li == 0:
            w_f, b_f = 0.5 * w, 0.5 * b
        else:
            w_f = 0.25 * w
            b_f = 0.5 * b + 0.25 * jnp.sum(w, axis=0)
        folded.append((w_f, b_f))
    return folded


def _ceil_to(x, m):
    return -(-x // m) * m


def _pick_block_rows(n):
    """Adaptive block size: big enough to amortize per-step pipeline overhead,
    small enough to avoid over-padding tiny inputs / blowing VMEM, and >= 2
    grid steps when possible so v7x's two TensorCores both get work."""
    n_ceil = _ceil_to(max(n, 1), _ROW_QUANTUM)
    steps = max(1, -(-n_ceil // _PREF_BLOCK_ROWS))
    if steps == 1 and n_ceil >= 2 * _ROW_QUANTUM:
        steps = 2
    return _ceil_to(-(-n_ceil // steps), _ROW_QUANTUM)


@jax.jit
def mlp_forward(x, params):
    """x: (..., 8) float32.  Returns sigmoid-MLP output of shape (..., 1)."""
    (w1, b1), (w2, b2), (w3, b3), (w4, b4) = params
    *lead, in_dim = x.shape
    assert in_dim == _DIMS[0], f"expected last dim {_DIMS[0]}, got {in_dim}"

    n = 1
    for d in lead:
        n *= d

    block_rows = _pick_block_rows(n)
    n_pad = _ceil_to(n, block_rows)
    r = block_rows // _LANES
    n_lane_rows = n_pad // _LANES

    # cast + pad + feature-major transpose (fused into one XLA op under jit).
    x2d = x.reshape(n, in_dim).astype(jnp.float32)
    if n_pad != n:
        x2d = jnp.pad(x2d, ((0, n_pad - n), (0, 0)))
    x3d = x2d.T.reshape(in_dim, n_lane_rows, _LANES)

    folded = _fold_params_for_tanh([(w1, b1), (w2, b2), (w3, b3), (w4, b4)])
    flat_params = jnp.concatenate(
        [jnp.concatenate([w.reshape(-1), b.reshape(-1)]) for w, b in folded])

    out2d = pl.pallas_call(
        _mlp_kernel,
        out_shape=jax.ShapeDtypeStruct((n_lane_rows, _LANES), jnp.float32),
        grid=(n_pad // block_rows,),
        in_specs=[pl.BlockSpec((in_dim, r, _LANES), lambda i: (0, i, 0)),
                  pl.BlockSpec(memory_space=pltpu.SMEM)],
        out_specs=pl.BlockSpec((r, _LANES), lambda i: (i, 0)),
        compiler_params=pltpu.CompilerParams(
            dimension_semantics=("parallel",)),
        cost_estimate=pl.CostEstimate(
            flops=166 * n_pad,            # 82 MACs + final affine per row
            transcendentals=13 * n_pad,   # one tanh per hidden/output unit
            bytes_accessed=(in_dim + 1) * 4 * n_pad + 4 * _NPARAMS,
        ),
    )(x3d, flat_params)

    out = out2d.reshape(n_pad)[:n]
    return out.reshape(*lead, 1)


def init_params(key):
    """torch.nn.Linear-style init: uniform(+-1/sqrt(fan_in)).
    Weights stored as (in_features, out_features); biases as (out_features,)."""
    dims = [(8, 6), (6, 4), (4, 2), (2, 1)]
    params = []
    for fan_in, fan_out in dims:
        key, kw, kb = jax.random.split(key, 3)
        bound = 1.0 / jnp.sqrt(float(fan_in))
        w = jax.random.uniform(kw, (fan_in, fan_out), jnp.float32, -bound, bound)
        b = jax.random.uniform(kb, (fan_out,), jnp.float32, -bound, bound)
        params.append((w, b))
    return params


def reference_forward(x, params):
    """Pure-JAX reference (matches PyTorch Linear+Sigmoid semantics)."""
    h = x.reshape(-1, x.shape[-1]).astype(jnp.float32)
    for w, b in params:
        h = jax.nn.sigmoid(h @ w + b)
    return h.reshape(*x.shape[:-1], 1)


if __name__ == "__main__":
    key = jax.random.PRNGKey(0)
    k_x, k_p = jax.random.split(key)

    batch, seq, in_dim = 2, 8, 8          # multi-dimensional input: (2, 8, 8)
    x = jax.random.normal(k_x, (batch, seq, in_dim), jnp.float32)
    params = init_params(k_p)

    out = jax.block_until_ready(mlp_forward(x, params))
    ref = reference_forward(x, params)

    assert out.shape == (batch, seq, 1), out.shape
    err = float(jnp.max(jnp.abs(out - ref)))
    assert err < 1e-5, err

    print("KERNEL_OK")
</pallas_src>

<mosaic_0001>
module attributes {stable_mosaic.version = 11 : i64} {
  func.func @_mlp_kernel(%arg0: i32, %arg1: memref<8x16x128xf32, #tpu.memory_space<vmem>>, %arg2: memref<95xf32, #tpu.memory_space<smem>>, %arg3: memref<16x128xf32, #tpu.memory_space<vmem>>) attributes {dimension_semantics = [#tpu.dimension_semantics<parallel>], iteration_bounds = array<i64: 1>, scalar_prefetch = 0 : i64, scratch_operands = 0 : i64, tpu.core_type = #tpu.core_type<tc>, window_params = [{transform_indices = @transform_0, window_bounds = array<i64: 8, 16, 128>}, {transform_indices = @transform_1, window_bounds = array<i64: 95>}, {transform_indices = @transform_2, window_bounds = array<i64: 16, 128>}]} {
    %c0 = arith.constant 0 : index
    %0 = memref.load %arg2[%c0] : memref<95xf32, #tpu.memory_space<smem>>
    %c1 = arith.constant 1 : index
    %1 = memref.load %arg2[%c1] : memref<95xf32, #tpu.memory_space<smem>>
    %c2 = arith.constant 2 : index
    %2 = memref.load %arg2[%c2] : memref<95xf32, #tpu.memory_space<smem>>
    %c3 = arith.constant 3 : index
    %3 = memref.load %arg2[%c3] : memref<95xf32, #tpu.memory_space<smem>>
    %c4 = arith.constant 4 : index
    %4 = memref.load %arg2[%c4] : memref<95xf32, #tpu.memory_space<smem>>
    %c5 = arith.constant 5 : index
    %5 = memref.load %arg2[%c5] : memref<95xf32, #tpu.memory_space<smem>>
    %c6 = arith.constant 6 : index
    %6 = memref.load %arg2[%c6] : memref<95xf32, #tpu.memory_space<smem>>
    %c7 = arith.constant 7 : index
    %7 = memref.load %arg2[%c7] : memref<95xf32, #tpu.memory_space<smem>>
    %c8 = arith.constant 8 : index
    %8 = memref.load %arg2[%c8] : memref<95xf32, #tpu.memory_space<smem>>
    %c9 = arith.constant 9 : index
    %9 = memref.load %arg2[%c9] : memref<95xf32, #tpu.memory_space<smem>>
    %c10 = arith.constant 10 : index
    %10 = memref.load %arg2[%c10] : memref<95xf32, #tpu.memory_space<smem>>
    %c11 = arith.constant 11 : index
    %11 = memref.load %arg2[%c11] : memref<95xf32, #tpu.memory_space<smem>>
    %c12 = arith.constant 12 : index
    %12 = memref.load %arg2[%c12] : memref<95xf32, #tpu.memory_space<smem>>
    %c13 = arith.constant 13 : index
    %13 = memref.load %arg2[%c13] : memref<95xf32, #tpu.memory_space<smem>>
    %c14 = arith.constant 14 : index
    %14 = memref.load %arg2[%c14] : memref<95xf32, #tpu.memory_space<smem>>
    %c15 = arith.constant 15 : index
    %15 = memref.load %arg2[%c15] : memref<95xf32, #tpu.memory_space<smem>>
    %c16 = arith.constant 16 : index
    %16 = memref.load %arg2[%c16] : memref<95xf32, #tpu.memory_space<smem>>
    %c17 = arith.constant 17 : index
    %17 = memref.load %arg2[%c17] : memref<95xf32, #tpu.memory_space<smem>>
    %c18 = arith.constant 18 : index
    %18 = memref.load %arg2[%c18] : memref<95xf32, #tpu.memory_space<smem>>
    %c19 = arith.constant 19 : index
    %19 = memref.load %arg2[%c19] : memref<95xf32, #tpu.memory_space<smem>>
    %c20 = arith.constant 20 : index
    %20 = memref.load %arg2[%c20] : memref<95xf32, #tpu.memory_space<smem>>
    %c21 = arith.constant 21 : index
    %21 = memref.load %arg2[%c21] : memref<95xf32, #tpu.memory_space<smem>>
    %c22 = arith.constant 22 : index
    %22 = memref.load %arg2[%c22] : memref<95xf32, #tpu.memory_space<smem>>
    %c23 = arith.constant 23 : index
    %23 = memref.load %arg2[%c23] : memref<95xf32, #tpu.memory_space<smem>>
    %c24 = arith.constant 24 : index
    %24 = memref.load %arg2[%c24] : memref<95xf32, #tpu.memory_space<smem>>
    %c25 = arith.constant 25 : index
    %25 = memref.load %arg2[%c25] : memref<95xf32, #tpu.memory_space<smem>>
    %c26 = arith.constant 26 : index
    %26 = memref.load %arg2[%c26] : memref<95xf32, #tpu.memory_space<smem>>
    %c27 = arith.constant 27 : index
    %27 = memref.load %arg2[%c27] : memref<95xf32, #tpu.memory_space<smem>>
    %c28 = arith.constant 28 : index
    %28 = memref.load %arg2[%c28] : memref<95xf32, #tpu.memory_space<smem>>
    %c29 = arith.constant 29 : index
    %29 = memref.load %arg2[%c29] : memref<95xf32, #tpu.memory_space<smem>>
    %c30 = arith.constant 30 : index
    %30 = memref.load %arg2[%c30] : memref<95xf32, #tpu.memory_space<smem>>
    %c31 = arith.constant 31 : index
    %31 = memref.load %arg2[%c31] : memref<95xf32, #tpu.memory_space<smem>>
    %c32 = arith.constant 32 : index
    %32 = memref.load %arg2[%c32] : memref<95xf32, #tpu.memory_space<smem>>
    %c33 = arith.constant 33 : index
    %33 = memref.load %arg2[%c33] : memref<95xf32, #tpu.memory_space<smem>>
    %c34 = arith.constant 34 : index
    %34 = memref.load %arg2[%c34] : memref<95xf32, #tpu.memory_space<smem>>
    %c35 = arith.constant 35 : index
    %35 = memref.load %arg2[%c35] : memref<95xf32, #tpu.memory_space<smem>>
    %c36 = arith.constant 36 : index
    %36 = memref.load %arg2[%c36] : memref<95xf32, #tpu.memory_space<smem>>
    %c37 = arith.constant 37 : index
    %37 = memref.load %arg2[%c37] : memref<95xf32, #tpu.memory_space<smem>>
    %c38 = arith.constant 38 : index
    %38 = memref.load %arg2[%c38] : memref<95xf32, #tpu.memory_space<smem>>
    %c39 = arith.constant 39 : index
    %39 = memref.load %arg2[%c39] : memref<95xf32, #tpu.memory_space<smem>>
    %c40 = arith.constant 40 : index
    %40 = memref.load %arg2[%c40] : memref<95xf32, #tpu.memory_space<smem>>
    %c41 = arith.constant 41 : index
    %41 = memref.load %arg2[%c41] : memref<95xf32, #tpu.memory_space<smem>>
    %c42 = arith.constant 42 : index
    %42 = memref.load %arg2[%c42] : memref<95xf32, #tpu.memory_space<smem>>
    %c43 = arith.constant 43 : index
    %43 = memref.load %arg2[%c43] : memref<95xf32, #tpu.memory_space<smem>>
    %c44 = arith.constant 44 : index
    %44 = memref.load %arg2[%c44] : memref<95xf32, #tpu.memory_space<smem>>
    %c45 = arith.constant 45 : index
    %45 = memref.load %arg2[%c45] : memref<95xf32, #tpu.memory_space<smem>>
    %c46 = arith.constant 46 : index
    %46 = memref.load %arg2[%c46] : memref<95xf32, #tpu.memory_space<smem>>
    %c47 = arith.constant 47 : index
    %47 = memref.load %arg2[%c47] : memref<95xf32, #tpu.memory_space<smem>>
    %c48 = arith.constant 48 : index
    %48 = memref.load %arg2[%c48] : memref<95xf32, #tpu.memory_space<smem>>
    %c49 = arith.constant 49 : index
    %49 = memref.load %arg2[%c49] : memref<95xf32, #tpu.memory_space<smem>>
    %c50 = arith.constant 50 : index
    %50 = memref.load %arg2[%c50] : memref<95xf32, #tpu.memory_space<smem>>
    %c51 = arith.constant 51 : index
    %51 = memref.load %arg2[%c51] : memref<95xf32, #tpu.memory_space<smem>>
    %c52 = arith.constant 52 : index
    %52 = memref.load %arg2[%c52] : memref<95xf32, #tpu.memory_space<smem>>
    %c53 = arith.constant 53 : index
    %53 = memref.load %arg2[%c53] : memref<95xf32, #tpu.memory_space<smem>>
    %c54 = arith.constant 54 : index
    %54 = memref.load %arg2[%c54] : memref<95xf32, #tpu.memory_space<smem>>
    %c55 = arith.constant 55 : index
    %55 = memref.load %arg2[%c55] : memref<95xf32, #tpu.memory_space<smem>>
    %c56 = arith.constant 56 : index
    %56 = memref.load %arg2[%c56] : memref<95xf32, #tpu.memory_space<smem>>
    %c57 = arith.constant 57 : index
    %57 = memref.load %arg2[%c57] : memref<95xf32, #tpu.memory_space<smem>>
    %c58 = arith.constant 58 : index
    %58 = memref.load %arg2[%c58] : memref<95xf32, #tpu.memory_space<smem>>
    %c59 = arith.constant 59 : index
    %59 = memref.load %arg2[%c59] : memref<95xf32, #tpu.memory_space<smem>>
    %c60 = arith.constant 60 : index
    %60 = memref.load %arg2[%c60] : memref<95xf32, #tpu.memory_space<smem>>
    %c61 = arith.constant 61 : index
    %61 = memref.load %arg2[%c61] : memref<95xf32, #tpu.memory_space<smem>>
    %c62 = arith.constant 62 : index
    %62 = memref.load %arg2[%c62] : memref<95xf32, #tpu.memory_space<smem>>
    %c63 = arith.constant 63 : index
    %63 = memref.load %arg2[%c63] : memref<95xf32, #tpu.memory_space<smem>>
    %c64 = arith.constant 64 : index
    %64 = memref.load %arg2[%c64] : memref<95xf32, #tpu.memory_space<smem>>
    %c65 = arith.constant 65 : index
    %65 = memref.load %arg2[%c65] : memref<95xf32, #tpu.memory_space<smem>>
    %c66 = arith.constant 66 : index
    %66 = memref.load %arg2[%c66] : memref<95xf32, #tpu.memory_space<smem>>
    %c67 = arith.constant 67 : index
    %67 = memref.load %arg2[%c67] : memref<95xf32, #tpu.memory_space<smem>>
    %c68 = arith.constant 68 : index
    %68 = memref.load %arg2[%c68] : memref<95xf32, #tpu.memory_space<smem>>
    %c69 = arith.constant 69 : index
    %69 = memref.load %arg2[%c69] : memref<95xf32, #tpu.memory_space<smem>>
    %c70 = arith.constant 70 : index
    %70 = memref.load %arg2[%c70] : memref<95xf32, #tpu.memory_space<smem>>
    %c71 = arith.constant 71 : index
    %71 = memref.load %arg2[%c71] : memref<95xf32, #tpu.memory_space<smem>>
    %c72 = arith.constant 72 : index
    %72 = memref.load %arg2[%c72] : memref<95xf32, #tpu.memory_space<smem>>
    %c73 = arith.constant 73 : index
    %73 = memref.load %arg2[%c73] : memref<95xf32, #tpu.memory_space<smem>>
    %c74 = arith.constant 74 : index
    %74 = memref.load %arg2[%c74] : memref<95xf32, #tpu.memory_space<smem>>
    %c75 = arith.constant 75 : index
    %75 = memref.load %arg2[%c75] : memref<95xf32, #tpu.memory_space<smem>>
    %c76 = arith.constant 76 : index
    %76 = memref.load %arg2[%c76] : memref<95xf32, #tpu.memory_space<smem>>
    %c77 = arith.constant 77 : index
    %77 = memref.load %arg2[%c77] : memref<95xf32, #tpu.memory_space<smem>>
    %c78 = arith.constant 78 : index
    %78 = memref.load %arg2[%c78] : memref<95xf32, #tpu.memory_space<smem>>
    %c79 = arith.constant 79 : index
    %79 = memref.load %arg2[%c79] : memref<95xf32, #tpu.memory_space<smem>>
    %c80 = arith.constant 80 : index
    %80 = memref.load %arg2[%c80] : memref<95xf32, #tpu.memory_space<smem>>
    %c81 = arith.constant 81 : index
    %81 = memref.load %arg2[%c81] : memref<95xf32, #tpu.memory_space<smem>>
    %c82 = arith.constant 82 : index
    %82 = memref.load %arg2[%c82] : memref<95xf32, #tpu.memory_space<smem>>
    %c83 = arith.constant 83 : index
    %83 = memref.load %arg2[%c83] : memref<95xf32, #tpu.memory_space<smem>>
    %c84 = arith.constant 84 : index
    %84 = memref.load %arg2[%c84] : memref<95xf32, #tpu.memory_space<smem>>
    %c85 = arith.constant 85 : index
    %85 = memref.load %arg2[%c85] : memref<95xf32, #tpu.memory_space<smem>>
    %c86 = arith.constant 86 : index
    %86 = memref.load %arg2[%c86] : memref<95xf32, #tpu.memory_space<smem>>
    %c87 = arith.constant 87 : index
    %87 = memref.load %arg2[%c87] : memref<95xf32, #tpu.memory_space<smem>>
    %c88 = arith.constant 88 : index
    %88 = memref.load %arg2[%c88] : memref<95xf32, #tpu.memory_space<smem>>
    %c89 = arith.constant 89 : index
    %89 = memref.load %arg2[%c89] : memref<95xf32, #tpu.memory_space<smem>>
    %c90 = arith.constant 90 : index
    %90 = memref.load %arg2[%c90] : memref<95xf32, #tpu.memory_space<smem>>
    %c91 = arith.constant 91 : index
    %91 = memref.load %arg2[%c91] : memref<95xf32, #tpu.memory_space<smem>>
    %c92 = arith.constant 92 : index
    %92 = memref.load %arg2[%c92] : memref<95xf32, #tpu.memory_space<smem>>
    %c93 = arith.constant 93 : index
    %93 = memref.load %arg2[%c93] : memref<95xf32, #tpu.memory_space<smem>>
    %c94 = arith.constant 94 : index
    %94 = memref.load %arg2[%c94] : memref<95xf32, #tpu.memory_space<smem>>
    %c0_i32 = arith.constant 0 : i32
    %c16_i32 = arith.constant 16 : i32
    %95 = arith.muli %c0_i32, %c16_i32 : i32
    %96 = tpu.assume_multiple %95, 16 : i32
    %c0_0 = arith.constant 0 : index
    %97 = arith.index_cast %96 : i32 to index
    %c0_1 = arith.constant 0 : index
    %98 = vector.load %arg1[%c0_0, %97, %c0_1] : memref<8x16x128xf32, #tpu.memory_space<vmem>>, vector<1x16x128xf32>
    %99 = vector.shape_cast %98 : vector<1x16x128xf32> to vector<16x128xf32>
    %c1_2 = arith.constant 1 : index
    %100 = arith.index_cast %96 : i32 to index
    %c0_3 = arith.constant 0 : index
    %101 = vector.load %arg1[%c1_2, %100, %c0_3] : memref<8x16x128xf32, #tpu.memory_space<vmem>>, vector<1x16x128xf32>
    %102 = vector.shape_cast %101 : vector<1x16x128xf32> to vector<16x128xf32>
    %c2_4 = arith.constant 2 : index
    %103 = arith.index_cast %96 : i32 to index
    %c0_5 = arith.constant 0 : index
    %104 = vector.load %arg1[%c2_4, %103, %c0_5] : memref<8x16x128xf32, #tpu.memory_space<vmem>>, vector<1x16x128xf32>
    %105 = vector.shape_cast %104 : vector<1x16x128xf32> to vector<16x128xf32>
    %c3_6 = arith.constant 3 : index
    %106 = arith.index_cast %96 : i32 to index
    %c0_7 = arith.constant 0 : index
    %107 = vector.load %arg1[%c3_6, %106, %c0_7] : memref<8x16x128xf32, #tpu.memory_space<vmem>>, vector<1x16x128xf32>
    %108 = vector.shape_cast %107 : vector<1x16x128xf32> to vector<16x128xf32>
    %c4_8 = arith.constant 4 : index
    %109 = arith.index_cast %96 : i32 to index
    %c0_9 = arith.constant 0 : index
    %110 = vector.load %arg1[%c4_8, %109, %c0_9] : memref<8x16x128xf32, #tpu.memory_space<vmem>>, vector<1x16x128xf32>
    %111 = vector.shape_cast %110 : vector<1x16x128xf32> to vector<16x128xf32>
    %c5_10 = arith.constant 5 : index
    %112 = arith.index_cast %96 : i32 to index
    %c0_11 = arith.constant 0 : index
    %113 = vector.load %arg1[%c5_10, %112, %c0_11] : memref<8x16x128xf32, #tpu.memory_space<vmem>>, vector<1x16x128xf32>
    %114 = vector.shape_cast %113 : vector<1x16x128xf32> to vector<16x128xf32>
    %c6_12 = arith.constant 6 : index
    %115 = arith.index_cast %96 : i32 to index
    %c0_13 = arith.constant 0 : index
    %116 = vector.load %arg1[%c6_12, %115, %c0_13] : memref<8x16x128xf32, #tpu.memory_space<vmem>>, vector<1x16x128xf32>
    %117 = vector.shape_cast %116 : vector<1x16x128xf32> to vector<16x128xf32>
    %c7_14 = arith.constant 7 : index
    %118 = arith.index_cast %96 : i32 to index
    %c0_15 = arith.constant 0 : index
    %119 = vector.load %arg1[%c7_14, %118, %c0_15] : memref<8x16x128xf32, #tpu.memory_space<vmem>>, vector<1x16x128xf32>
    %120 = vector.shape_cast %119 : vector<1x16x128xf32> to vector<16x128xf32>
    %121 = vector.broadcast %0 : f32 to vector<16x128xf32>
    %122 = arith.mulf %99, %121 : vector<16x128xf32>
    %123 = vector.broadcast %48 : f32 to vector<16x128xf32>
    %124 = arith.addf %122, %123 : vector<16x128xf32>
    %125 = vector.broadcast %6 : f32 to vector<16x128xf32>
    %126 = arith.mulf %102, %125 : vector<16x128xf32>
    %127 = arith.addf %124, %126 : vector<16x128xf32>
    %128 = vector.broadcast %12 : f32 to vector<16x128xf32>
    %129 = arith.mulf %105, %128 : vector<16x128xf32>
    %130 = arith.addf %127, %129 : vector<16x128xf32>
    %131 = vector.broadcast %18 : f32 to vector<16x128xf32>
    %132 = arith.mulf %108, %131 : vector<16x128xf32>
    %133 = arith.addf %130, %132 : vector<16x128xf32>
    %134 = vector.broadcast %24 : f32 to vector<16x128xf32>
    %135 = arith.mulf %111, %134 : vector<16x128xf32>
    %136 = arith.addf %133, %135 : vector<16x128xf32>
    %137 = vector.broadcast %30 : f32 to vector<16x128xf32>
    %138 = arith.mulf %114, %137 : vector<16x128xf32>
    %139 = arith.addf %136, %138 : vector<16x128xf32>
    %140 = vector.broadcast %36 : f32 to vector<16x128xf32>
    %141 = arith.mulf %117, %140 : vector<16x128xf32>
    %142 = arith.addf %139, %141 : vector<16x128xf32>
    %143 = vector.broadcast %42 : f32 to vector<16x128xf32>
    %144 = arith.mulf %120, %143 : vector<16x128xf32>
    %145 = arith.addf %142, %144 : vector<16x128xf32>
    %146 = math.tanh %145 : vector<16x128xf32>
    %147 = vector.broadcast %1 : f32 to vector<16x128xf32>
    %148 = arith.mulf %99, %147 : vector<16x128xf32>
    %149 = vector.broadcast %49 : f32 to vector<16x128xf32>
    %150 = arith.addf %148, %149 : vector<16x128xf32>
    %151 = vector.broadcast %7 : f32 to vector<16x128xf32>
    %152 = arith.mulf %102, %151 : vector<16x128xf32>
    %153 = arith.addf %150, %152 : vector<16x128xf32>
    %154 = vector.broadcast %13 : f32 to vector<16x128xf32>
    %155 = arith.mulf %105, %154 : vector<16x128xf32>
    %156 = arith.addf %153, %155 : vector<16x128xf32>
    %157 = vector.broadcast %19 : f32 to vector<16x128xf32>
    %158 = arith.mulf %108, %157 : vector<16x128xf32>
    %159 = arith.addf %156, %158 : vector<16x128xf32>
    %160 = vector.broadcast %25 : f32 to vector<16x128xf32>
    %161 = arith.mulf %111, %160 : vector<16x128xf32>
    %162 = arith.addf %159, %161 : vector<16x128xf32>
    %163 = vector.broadcast %31 : f32 to vector<16x128xf32>
    %164 = arith.mulf %114, %163 : vector<16x128xf32>
    %165 = arith.addf %162, %164 : vector<16x128xf32>
    %166 = vector.broadcast %37 : f32 to vector<16x128xf32>
    %167 = arith.mulf %117, %166 : vector<16x128xf32>
    %168 = arith.addf %165, %167 : vector<16x128xf32>
    %169 = vector.broadcast %43 : f32 to vector<16x128xf32>
    %170 = arith.mulf %120, %169 : vector<16x128xf32>
    %171 = arith.addf %168, %170 : vector<16x128xf32>
    %172 = math.tanh %171 : vector<16x128xf32>
    %173 = vector.broadcast %2 : f32 to vector<16x128xf32>
    %174 = arith.mulf %99, %173 : vector<16x128xf32>
    %175 = vector.broadcast %50 : f32 to vector<16x128xf32>
    %176 = arith.addf %174, %175 : vector<16x128xf32>
    %177 = vector.broadcast %8 : f32 to vector<16x128xf32>
    %178 = arith.mulf %102, %177 : vector<16x128xf32>
    %179 = arith.addf %176, %178 : vector<16x128xf32>
    %180 = vector.broadcast %14 : f32 to vector<16x128xf32>
    %181 = arith.mulf %105, %180 : vector<16x128xf32>
    %182 = arith.addf %179, %181 : vector<16x128xf32>
    %183 = vector.broadcast %20 : f32 to vector<16x128xf32>
    %184 = arith.mulf %108, %183 : vector<16x128xf32>
    %185 = arith.addf %182, %184 : vector<16x128xf32>
    %186 = vector.broadcast %26 : f32 to vector<16x128xf32>
    %187 = arith.mulf %111, %186 : vector<16x128xf32>
    %188 = arith.addf %185, %187 : vector<16x128xf32>
    %189 = vector.broadcast %32 : f32 to vector<16x128xf32>
    %190 = arith.mulf %114, %189 : vector<16x128xf32>
    %191 = arith.addf %188, %190 : vector<16x128xf32>
    %192 = vector.broadcast %38 : f32 to vector<16x128xf32>
    %193 = arith.mulf %117, %192 : vector<16x128xf32>
    %194 = arith.addf %191, %193 : vector<16x128xf32>
    %195 = vector.broadcast %44 : f32 to vector<16x128xf32>
    %196 = arith.mulf %120, %195 : vector<16x128xf32>
    %197 = arith.addf %194, %196 : vector<16x128xf32>
    %198 = math.tanh %197 : vector<16x128xf32>
    %199 = vector.broadcast %3 : f32 to vector<16x128xf32>
    %200 = arith.mulf %99, %199 : vector<16x128xf32>
    %201 = vector.broadcast %51 : f32 to vector<16x128xf32>
    %202 = arith.addf %200, %201 : vector<16x128xf32>
    %203 = vector.broadcast %9 : f32 to vector<16x128xf32>
    %204 = arith.mulf %102, %203 : vector<16x128xf32>
    %205 = arith.addf %202, %204 : vector<16x128xf32>
    %206 = vector.broadcast %15 : f32 to vector<16x128xf32>
    %207 = arith.mulf %105, %206 : vector<16x128xf32>
    %208 = arith.addf %205, %207 : vector<16x128xf32>
    %209 = vector.broadcast %21 : f32 to vector<16x128xf32>
    %210 = arith.mulf %108, %209 : vector<16x128xf32>
    %211 = arith.addf %208, %210 : vector<16x128xf32>
    %212 = vector.broadcast %27 : f32 to vector<16x128xf32>
    %213 = arith.mulf %111, %212 : vector<16x128xf32>
    %214 = arith.addf %211, %213 : vector<16x128xf32>
    %215 = vector.broadcast %33 : f32 to vector<16x128xf32>
    %216 = arith.mulf %114, %215 : vector<16x128xf32>
    %217 = arith.addf %214, %216 : vector<16x128xf32>
    %218 = vector.broadcast %39 : f32 to vector<16x128xf32>
    %219 = arith.mulf %117, %218 : vector<16x128xf32>
    %220 = arith.addf %217, %219 : vector<16x128xf32>
    %221 = vector.broadcast %45 : f32 to vector<16x128xf32>
    %222 = arith.mulf %120, %221 : vector<16x128xf32>
    %223 = arith.addf %220, %222 : vector<16x128xf32>
    %224 = math.tanh %223 : vector<16x128xf32>
    %225 = vector.broadcast %4 : f32 to vector<16x128xf32>
    %226 = arith.mulf %99, %225 : vector<16x128xf32>
    %227 = vector.broadcast %52 : f32 to vector<16x128xf32>
    %228 = arith.addf %226, %227 : vector<16x128xf32>
    %229 = vector.broadcast %10 : f32 to vector<16x128xf32>
    %230 = arith.mulf %102, %229 : vector<16x128xf32>
    %231 = arith.addf %228, %230 : vector<16x128xf32>
    %232 = vector.broadcast %16 : f32 to vector<16x128xf32>
    %233 = arith.mulf %105, %232 : vector<16x128xf32>
    %234 = arith.addf %231, %233 : vector<16x128xf32>
    %235 = vector.broadcast %22 : f32 to vector<16x128xf32>
    %236 = arith.mulf %108, %235 : vector<16x128xf32>
    %237 = arith.addf %234, %236 : vector<16x128xf32>
    %238 = vector.broadcast %28 : f32 to vector<16x128xf32>
    %239 = arith.mulf %111, %238 : vector<16x128xf32>
    %240 = arith.addf %237, %239 : vector<16x128xf32>
    %241 = vector.broadcast %34 : f32 to vector<16x128xf32>
    %242 = arith.mulf %114, %241 : vector<16x128xf32>
    %243 = arith.addf %240, %242 : vector<16x128xf32>
    %244 = vector.broadcast %40 : f32 to vector<16x128xf32>
    %245 = arith.mulf %117, %244 : vector<16x128xf32>
    %246 = arith.addf %243, %245 : vector<16x128xf32>
    %247 = vector.broadcast %46 : f32 to vector<16x128xf32>
    %248 = arith.mulf %120, %247 : vector<16x128xf32>
    %249 = arith.addf %246, %248 : vector<16x128xf32>
    %250 = math.tanh %249 : vector<16x128xf32>
    %251 = vector.broadcast %5 : f32 to vector<16x128xf32>
    %252 = arith.mulf %99, %251 : vector<16x128xf32>
    %253 = vector.broadcast %53 : f32 to vector<16x128xf32>
    %254 = arith.addf %252, %253 : vector<16x128xf32>
    %255 = vector.broadcast %11 : f32 to vector<16x128xf32>
    %256 = arith.mulf %102, %255 : vector<16x128xf32>
    %257 = arith.addf %254, %256 : vector<16x128xf32>
    %258 = vector.broadcast %17 : f32 to vector<16x128xf32>
    %259 = arith.mulf %105, %258 : vector<16x128xf32>
    %260 = arith.addf %257, %259 : vector<16x128xf32>
    %261 = vector.broadcast %23 : f32 to vector<16x128xf32>
    %262 = arith.mulf %108, %261 : vector<16x128xf32>
    %263 = arith.addf %260, %262 : vector<16x128xf32>
    %264 = vector.broadcast %29 : f32 to vector<16x128xf32>
    %265 = arith.mulf %111, %264 : vector<16x128xf32>
    %266 = arith.addf %263, %265 : vector<16x128xf32>
    %267 = vector.broadcast %35 : f32 to vector<16x128xf32>
    %268 = arith.mulf %114, %267 : vector<16x128xf32>
    %269 = arith.addf %266, %268 : vector<16x128xf32>
    %270 = vector.broadcast %41 : f32 to vector<16x128xf32>
    %271 = arith.mulf %117, %270 : vector<16x128xf32>
    %272 = arith.addf %269, %271 : vector<16x128xf32>
    %273 = vector.broadcast %47 : f32 to vector<16x128xf32>
    %274 = arith.mulf %120, %273 : vector<16x128xf32>
    %275 = arith.addf %272, %274 : vector<16x128xf32>
    %276 = math.tanh %275 : vector<16x128xf32>
    %277 = vector.broadcast %54 : f32 to vector<16x128xf32>
    %278 = arith.mulf %146, %277 : vector<16x128xf32>
    %279 = vector.broadcast %78 : f32 to vector<16x128xf32>
    %280 = arith.addf %278, %279 : vector<16x128xf32>
    %281 = vector.broadcast %58 : f32 to vector<16x128xf32>
    %282 = arith.mulf %172, %281 : vector<16x128xf32>
    %283 = arith.addf %280, %282 : vector<16x128xf32>
    %284 = vector.broadcast %62 : f32 to vector<16x128xf32>
    %285 = arith.mulf %198, %284 : vector<16x128xf32>
    %286 = arith.addf %283, %285 : vector<16x128xf32>
    %287 = vector.broadcast %66 : f32 to vector<16x128xf32>
    %288 = arith.mulf %224, %287 : vector<16x128xf32>
    %289 = arith.addf %286, %288 : vector<16x128xf32>
    %290 = vector.broadcast %70 : f32 to vector<16x128xf32>
    %291 = arith.mulf %250, %290 : vector<16x128xf32>
    %292 = arith.addf %289, %291 : vector<16x128xf32>
    %293 = vector.broadcast %74 : f32 to vector<16x128xf32>
    %294 = arith.mulf %276, %293 : vector<16x128xf32>
    %295 = arith.addf %292, %294 : vector<16x128xf32>
    %296 = math.tanh %295 : vector<16x128xf32>
    %297 = vector.broadcast %55 : f32 to vector<16x128xf32>
    %298 = arith.mulf %146, %297 : vector<16x128xf32>
    %299 = vector.broadcast %79 : f32 to vector<16x128xf32>
    %300 = arith.addf %298, %299 : vector<16x128xf32>
    %301 = vector.broadcast %59 : f32 to vector<16x128xf32>
    %302 = arith.mulf %172, %301 : vector<16x128xf32>
    %303 = arith.addf %300, %302 : vector<16x128xf32>
    %304 = vector.broadcast %63 : f32 to vector<16x128xf32>
    %305 = arith.mulf %198, %304 : vector<16x128xf32>
    %306 = arith.addf %303, %305 : vector<16x128xf32>
    %307 = vector.broadcast %67 : f32 to vector<16x128xf32>
    %308 = arith.mulf %224, %307 : vector<16x128xf32>
    %309 = arith.addf %306, %308 : vector<16x128xf32>
    %310 = vector.broadcast %71 : f32 to vector<16x128xf32>
    %311 = arith.mulf %250, %310 : vector<16x128xf32>
    %312 = arith.addf %309, %311 : vector<16x128xf32>
    %313 = vector.broadcast %75 : f32 to vector<16x128xf32>
    %314 = arith.mulf %276, %313 : vector<16x128xf32>
    %315 = arith.addf %312, %314 : vector<16x128xf32>
    %316 = math.tanh %315 : vector<16x128xf32>
    %317 = vector.broadcast %56 : f32 to vector<16x128xf32>
    %318 = arith.mulf %146, %317 : vector<16x128xf32>
    %319 = vector.broadcast %80 : f32 to vector<16x128xf32>
    %320 = arith.addf %318, %319 : vector<16x128xf32>
    %321 = vector.broadcast %60 : f32 to vector<16x128xf32>
    %322 = arith.mulf %172, %321 : vector<16x128xf32>
    %323 = arith.addf %320, %322 : vector<16x128xf32>
    %324 = vector.broadcast %64 : f32 to vector<16x128xf32>
    %325 = arith.mulf %198, %324 : vector<16x128xf32>
    %326 = arith.addf %323, %325 : vector<16x128xf32>
    %327 = vector.broadcast %68 : f32 to vector<16x128xf32>
    %328 = arith.mulf %224, %327 : vector<16x128xf32>
    %329 = arith.addf %326, %328 : vector<16x128xf32>
    %330 = vector.broadcast %72 : f32 to vector<16x128xf32>
    %331 = arith.mulf %250, %330 : vector<16x128xf32>
    %332 = arith.addf %329, %331 : vector<16x128xf32>
    %333 = vector.broadcast %76 : f32 to vector<16x128xf32>
    %334 = arith.mulf %276, %333 : vector<16x128xf32>
    %335 = arith.addf %332, %334 : vector<16x128xf32>
    %336 = math.tanh %335 : vector<16x128xf32>
    %337 = vector.broadcast %57 : f32 to vector<16x128xf32>
    %338 = arith.mulf %146, %337 : vector<16x128xf32>
    %339 = vector.broadcast %81 : f32 to vector<16x128xf32>
    %340 = arith.addf %338, %339 : vector<16x128xf32>
    %341 = vector.broadcast %61 : f32 to vector<16x128xf32>
    %342 = arith.mulf %172, %341 : vector<16x128xf32>
    %343 = arith.addf %340, %342 : vector<16x128xf32>
    %344 = vector.broadcast %65 : f32 to vector<16x128xf32>
    %345 = arith.mulf %198, %344 : vector<16x128xf32>
    %346 = arith.addf %343, %345 : vector<16x128xf32>
    %347 = vector.broadcast %69 : f32 to vector<16x128xf32>
    %348 = arith.mulf %224, %347 : vector<16x128xf32>
    %349 = arith.addf %346, %348 : vector<16x128xf32>
    %350 = vector.broadcast %73 : f32 to vector<16x128xf32>
    %351 = arith.mulf %250, %350 : vector<16x128xf32>
    %352 = arith.addf %349, %351 : vector<16x128xf32>
    %353 = vector.broadcast %77 : f32 to vector<16x128xf32>
    %354 = arith.mulf %276, %353 : vector<16x128xf32>
    %355 = arith.addf %352, %354 : vector<16x128xf32>
    %356 = math.tanh %355 : vector<16x128xf32>
    %357 = vector.broadcast %82 : f32 to vector<16x128xf32>
    %358 = arith.mulf %296, %357 : vector<16x128xf32>
    %359 = vector.broadcast %90 : f32 to vector<16x128xf32>
    %360 = arith.addf %358, %359 : vector<16x128xf32>
    %361 = vector.broadcast %84 : f32 to vector<16x128xf32>
    %362 = arith.mulf %316, %361 : vector<16x128xf32>
    %363 = arith.addf %360, %362 : vector<16x128xf32>
    %364 = vector.broadcast %86 : f32 to vector<16x128xf32>
    %365 = arith.mulf %336, %364 : vector<16x128xf32>
    %366 = arith.addf %363, %365 : vector<16x128xf32>
    %367 = vector.broadcast %88 : f32 to vector<16x128xf32>
    %368 = arith.mulf %356, %367 : vector<16x128xf32>
    %369 = arith.addf %366, %368 : vector<16x128xf32>
    %370 = math.tanh %369 : vector<16x128xf32>
    %371 = vector.broadcast %83 : f32 to vector<16x128xf32>
    %372 = arith.mulf %296, %371 : vector<16x128xf32>
    %373 = vector.broadcast %91 : f32 to vector<16x128xf32>
    %374 = arith.addf %372, %373 : vector<16x128xf32>
    %375 = vector.broadcast %85 : f32 to vector<16x128xf32>
    %376 = arith.mulf %316, %375 : vector<16x128xf32>
    %377 = arith.addf %374, %376 : vector<16x128xf32>
    %378 = vector.broadcast %87 : f32 to vector<16x128xf32>
    %379 = arith.mulf %336, %378 : vector<16x128xf32>
    %380 = arith.addf %377, %379 : vector<16x128xf32>
    %381 = vector.broadcast %89 : f32 to vector<16x128xf32>
    %382 = arith.mulf %356, %381 : vector<16x128xf32>
    %383 = arith.addf %380, %382 : vector<16x128xf32>
    %384 = math.tanh %383 : vector<16x128xf32>
    %385 = vector.broadcast %92 : f32 to vector<16x128xf32>
    %386 = arith.mulf %370, %385 : vector<16x128xf32>
    %387 = vector.broadcast %94 : f32 to vector<16x128xf32>
    %388 = arith.addf %386, %387 : vector<16x128xf32>
    %389 = vector.broadcast %93 : f32 to vector<16x128xf32>
    %390 = arith.mulf %384, %389 : vector<16x128xf32>
    %391 = arith.addf %388, %390 : vector<16x128xf32>
    %392 = math.tanh %391 : vector<16x128xf32>
    %cst = arith.constant 5.000000e-01 : f32
    %393 = vector.broadcast %cst : f32 to vector<16x128xf32>
    %394 = arith.mulf %392, %393 : vector<16x128xf32>
    %cst_16 = arith.constant 5.000000e-01 : f32
    %395 = vector.broadcast %cst_16 : f32 to vector<16x128xf32>
    %396 = arith.addf %394, %395 : vector<16x128xf32>
    %397 = arith.index_cast %96 : i32 to index
    %c0_17 = arith.constant 0 : index
    %398 = vector.load %arg3[%397, %c0_17] : memref<16x128xf32, #tpu.memory_space<vmem>>, vector<16x128xf32>
    tpu.vector_store %arg3[%397, %c0_17], %396 {strides = array<i32>} : memref<16x128xf32, #tpu.memory_space<vmem>>, vector<16x128xf32>,
    %c1_i32 = arith.constant 1 : i32
    return
  }
  func.func @transform_0(%arg0: i32) -> (i32, i32, i32) {
    %c0_i32 = arith.constant 0 : i32
    %c0_i32_0 = arith.constant 0 : i32
    %c0_i32_1 = arith.constant 0 : i32
    return %c0_i32, %arg0, %c0_i32_0 : i32, i32, i32
  }
  func.func @transform_1(%arg0: i32) -> i32 {
    %c0_i32 = arith.constant 0 : i32
    %c0_i32_0 = arith.constant 0 : i32
    return %c0_i32 : i32
  }
  func.func @transform_2(%arg0: i32) -> (i32, i32) {
    %c0_i32 = arith.constant 0 : i32
    %c0_i32_0 = arith.constant 0 : i32
    return %arg0, %c0_i32 : i32, i32
  }
}

</mosaic_0001>

<bundles_post_ra>
// kernel: mlp_forward.1
= control target key start
LH: loop header
LB: loop body
LE: loop exit
PB: predicated region body
PF: predicated region fallthrough
CT: control target
= control target key end

     0   :  { %7 = vsyncpa [#allocation3], 0  ;;  %s1529_s0 = inlined_call_operand.vmem [shape: f32[8,16,128], index: 0, kind: input, shape index: {}]   ;;  %s1530_s1 = inlined_call_operand.vmem [shape: f32[95], index: 1, kind: input, shape index: {}]   ;;  %s1531_s2 = inlined_call_operand.vmem [shape: f32[16,128], index: 2, kind: output, shape index: {}]  }
   0x1   :  { %s16_s11 = sshll.u32 %s1530_s1, 4  ;;  %s17_s11 = int_to_ptr.vmem [resolvable:$true] %s16_s11 }
   0x2   :  { %s777_s12 = scalar_lea.vmem %s17_s11, 16  ;;  %p782_p1 = scmp.lt.s32.totalorder %s17_s11, %s17_s11 }
   0x3   :  { %p778_p0 = scmp.ne.s32.totalorder %s17_s11, %s777_s12  ;;  %p783_p2 = scmp.lt.s32.totalorder %s777_s12, %s777_s12 }
   0x5   :  { %p784_p3 = por %p783_p2, %p782_p1 }
   0x7   :  { %p785_p4 = pnand %p784_p3, %p778_p0 }
   0x9   :  { %788 = shalt.err (!%p785_p4)
}
   0xa   :  { %s791_s13 = smov [#allocation2]  }
   0xb   :  { %19 = dma.vmem_to_smem %s17_s11, 16, %s791_s13, [#allocation3]  }
   0xc   :  { %789 = dma.done.wait [#allocation3], 16  }
   0xd   :  { %790 = vsyncadd [#allocation3], 4294967280 }
   0xe   :  { %23 = sfence }
   0xf   :  { %s24_s14 = sld [smem:[#allocation2]]  ;;  %v119_v0 = vld [vmem:[%s1529_s0] sm:$0xff]  ;;  %v120_v1 = vld [vmem:[%s1529_s0 + $0x8] sm:$0xff]  ;;  %v710_v13 = vld [vmem:[%s1529_s0 + $0x10] sm:$0xff] }
  0x10   :  { %s810_s15 = sld [smem:[#allocation2 + $0x1]]  ;;  %v711_v14 = vld [vmem:[%s1529_s0 + $0x18] sm:$0xff]  ;;  %v712_v31 = vld [vmem:[%s1529_s0 + $0x20] sm:$0xff]  ;;  %v713_v32 = vld [vmem:[%s1529_s0 + $0x28] sm:$0xff] }
  0x11   :  { %s812_s16 = sld [smem:[#allocation2 + $0x2]]  ;;  %v714_v49 = vld [vmem:[%s1529_s0 + $0x30] sm:$0xff]  ;;  %v715_v54 = vld [vmem:[%s1529_s0 + $0x38] sm:$0xff] }
  0x12   :  { %s814_s17 = sld [smem:[#allocation2 + $0x3]] }
  0x13   :  { %s816_s1 = sld [smem:[#allocation2 + $0x4]] }
  0x14   :  { %s818_s18 = sld [smem:[#allocation2 + $0x5]] }
  0x15   :  { %s820_s19 = sld [smem:[#allocation2 + $0x6]]  ;;  %v149_v2 = vstv %s24_s14 }
  0x16   :  { %s822_s20 = sld [smem:[#allocation2 + $0x7]]  ;;  %v192_v3 = vstv %s810_s15  ;;  %v859_v6 = vmul.f32 %v149_v2, %v119_v0  ;;  %v861_v7 = vmul.f32 %v149_v2, %v120_v1 }
  0x17   :  { %s824_s21 = sld [smem:[#allocation2 + $0x8]]  ;;  %v235_v4 = vstv %s812_s16  ;;  %v866_v9 = vmul.f32 %v192_v3, %v119_v0  ;;  %v868_v10 = vmul.f32 %v192_v3, %v120_v1 }
  0x18   :  { %s826_s22 = sld [smem:[#allocation2 + $0x9]]  ;;  %v278_v5 = vstv %s814_s17  ;;  %v870_v11 = vmul.f32 %v235_v4, %v119_v0  ;;  %v883_v17 = vmul.f32 %v235_v4, %v120_v1 }
  0x19   :  { %s828_s23 = sld [smem:[#allocation2 + $0xa]]  ;;  %v321_v8 = vstv %s816_s1  ;;  %v885_v18 = vmul.f32 %v278_v5, %v119_v0  ;;  %v890_v20 = vmul.f32 %v278_v5, %v120_v1 }
  0x1a   :  { %s830_s24 = sld [smem:[#allocation2 + $0xb]]  ;;  %v364_v12 = vstv %s818_s18  ;;  %v892_v21 = vmul.f32 %v321_v8, %v119_v0  ;;  %v894_v22 = vmul.f32 %v321_v8, %v120_v1 }
  0x1b   :  { %s832_s25 = sld [smem:[#allocation2 + $0xc]]  ;;  %v155_v15 = vstv %s820_s19  ;;  %v900_v25 = vmul.f32 %v364_v12, %v119_v0  ;;  %v902_v26 = vmul.f32 %v364_v12, %v120_v1  ;;  %v716_v12 = vld [vmem:[%s1529_s0 + $0x40] sm:$0xff] }
  0x1c   :  { %s834_s26 = sld [smem:[#allocation2 + $0xd]]  ;;  %v198_v16 = vstv %s822_s20  ;;  %1532 = vst [vmem:[#allocation5_spill] sm:$0xff] %v892_v21  ;;  %1533 = vst [vmem:[#allocation6_spill] sm:$0xff] %v894_v22  ;;  %v906_v27 = vmul.f32 %v710_v13, %v155_v15  ;;  %v908_v28 = vmul.f32 %v711_v14, %v155_v15 }
  0x1d   :  { %s836_s27 = sld [smem:[#allocation2 + $0xe]]  ;;  %v241_v19 = vstv %s824_s21  ;;  %1534 = vst [vmem:[#allocation7_spill] sm:$0xff] %v900_v25  ;;  %1535 = vst [vmem:[#allocation8_spill] sm:$0xff] %v902_v26  ;;  %v910_v29 = vmul.f32 %v710_v13, %v198_v16  ;;  %v922_v34 = vmul.f32 %v711_v14, %v198_v16 }
  0x1e   :  { %s838_s28 = sld [smem:[#allocation2 + $0xf]]  ;;  %v284_v23 = vstv %s826_s22  ;;  %v924_v35 = vmul.f32 %v710_v13, %v241_v19  ;;  %v926_v36 = vmul.f32 %v711_v14, %v241_v19 }
  0x1f   :  { %s840_s29 = sld [smem:[#allocation2 + $0x10]]  ;;  %v327_v24 = vstv %s828_s23  ;;  %v931_v38 = vmul.f32 %v710_v13, %v284_v23  ;;  %v933_v39 = vmul.f32 %v711_v14, %v284_v23 }
  0x20   :  { %s842_s30 = sld [smem:[#allocation2 + $0x11]]  ;;  %v370_v30 = vstv %s830_s24  ;;  %v935_v40 = vmul.f32 %v710_v13, %v327_v24  ;;  %v941_v43 = vmul.f32 %v711_v14, %v327_v24 }
  0x21   :  { %s850_s7 = sld [smem:[#allocation2 + $0x12]]  ;;  %v160_v33 = vstv %s832_s25  ;;  %v943_v44 = vmul.f32 %v710_v13, %v370_v30  ;;  %v952_v48 = vmul.f32 %v711_v14, %v370_v30  ;;  %v717_v13 = vld [vmem:[%s1529_s0 + $0x48] sm:$0xff] }
  0x22   :  { %s854_s8 = sld [smem:[#allocation2 + $0x13]]  ;;  %v203_v37 = vstv %s834_s26  ;;  %1536 = vst [vmem:[#allocation9_spill] sm:$0xff] %v935_v40  ;;  %1537 = vst [vmem:[#allocation10_spill] sm:$0xff] %v941_v43  ;;  %v947_v45 = vmul.f32 %v712_v31, %v160_v33  ;;  %v949_v46 = vmul.f32 %v713_v32, %v160_v33 }
  0x23   :  { %s857_s9 = sld [smem:[#allocation2 + $0x14]]  ;;  %v246_v41 = vstv %s836_s27  ;;  %1538 = vst [vmem:[#allocation11_spill] sm:$0xff] %v943_v44  ;;  %1539 = vst [vmem:[#allocation12_spill] sm:$0xff] %v952_v48  ;;  %v960_v51 = vmul.f32 %v712_v31, %v203_v37  ;;  %v962_v52 = vmul.f32 %v713_v32, %v203_v37 }
  0x24   :  { %s864_s10 = sld [smem:[#allocation2 + $0x15]]  ;;  %v289_v42 = vstv %s838_s28  ;;  %v971_v56 = vmul.f32 %v712_v31, %v246_v41  ;;  %v973_v57 = vmul.f32 %v713_v32, %v246_v41 }
  0x25   :  { %s873_s11 = sld [smem:[#allocation2 + $0x16]]  ;;  %v332_v47 = vstv %s840_s29  ;;  %v975_v58 = vmul.f32 %v712_v31, %v289_v42  ;;  %v980_v60 = vmul.f32 %v713_v32, %v289_v42 }
  0x26   :  { %s887_s16 = sld [smem:[#allocation2 + $0x17]]  ;;  %v375_v53 = vstv %s842_s30  ;;  %v982_v61 = vmul.f32 %v712_v31, %v332_v47  ;;  %v984_v62 = vmul.f32 %v713_v32, %v332_v47 }
  0x27   :  { %s896_s17 = sld [smem:[#allocation2 + $0x18]]  ;;  %v165_v50 = vstv %s850_s7  ;;  %v991_v1 = vmul.f32 %v712_v31, %v375_v53  ;;  %v993_v2 = vmul.f32 %v713_v32, %v375_v53 }
  0x28   :  { %s904_s1 = sld [smem:[#allocation2 + $0x19]]  ;;  %v208_v55 = vstv %s854_s8  ;;  %1540 = vst [vmem:[#allocation13_spill] sm:$0xff] %v982_v61  ;;  %1541 = vst [vmem:[#allocation14_spill] sm:$0xff] %v984_v62  ;;  %v988_v63 = vmul.f32 %v714_v49, %v165_v50  ;;  %v997_v3 = vmul.f32 %v715_v54, %v165_v50 }
  0x29   :  { %s913_s18 = sld [smem:[#allocation2 + $0x1a]]  ;;  %v251_v59 = vstv %s857_s9  ;;  %1542 = vst [vmem:[#allocation15_spill] sm:$0xff] %v991_v1  ;;  %1543 = vst [vmem:[#allocation16_spill] sm:$0xff] %v993_v2  ;;  %v999_v4 = vmul.f32 %v714_v49, %v208_v55  ;;  %v1012_v15 = vmul.f32 %v715_v54, %v208_v55 }
  0x2a   :  { %s928_s23 = sld [smem:[#allocation2 + $0x1b]]  ;;  %v294_v0 = vstv %s864_s10  ;;  %v1014_v16 = vmul.f32 %v714_v49, %v251_v59  ;;  %v1016_v19 = vmul.f32 %v715_v54, %v251_v59 }
  0x2b   :  { %s937_s24 = sld [smem:[#allocation2 + $0x1c]]  ;;  %v337_v5 = vstv %s873_s11  ;;  %v1022_v30 = vmul.f32 %v714_v49, %v294_v0  ;;  %v1024_v31 = vmul.f32 %v715_v54, %v294_v0 }
  0x2c   :  { %s945_s25 = sld [smem:[#allocation2 + $0x1d]]  ;;  %v380_v8 = vstv %s887_s16  ;;  %v1029_v33 = vmul.f32 %v714_v49, %v337_v5  ;;  %v1031_v37 = vmul.f32 %v715_v54, %v337_v5  ;;  %v718_v5 = vld [vmem:[%s1529_s0 + $0x50] sm:$0xff] }
  0x2d   :  { %s954_s26 = sld [smem:[#allocation2 + $0x1e]]  ;;  %v170_v14 = vstv %s896_s17  ;;  %v1033_v41 = vmul.f32 %v714_v49, %v380_v8  ;;  %v1042_v53 = vmul.f32 %v715_v54, %v380_v8  ;;  %v719_v54 = vld [vmem:[%s1529_s0 + $0x58] sm:$0xff] }
  0x2e   :  { %s965_s28 = sld [smem:[#allocation2 + $0x1f]]  ;;  %v213_v23 = vstv %s904_s1  ;;  %1544 = vst [vmem:[#allocation17_spill] sm:$0xff] %v1029_v33  ;;  %1545 = vst [vmem:[#allocation18_spill] sm:$0xff] %v1031_v37  ;;  %v1037_v42 = vmul.f32 %v716_v12, %v170_v14  ;;  %v1039_v47 = vmul.f32 %v717_v13, %v170_v14 }
  0x2f   :  { %s977_s29 = sld [smem:[#allocation2 + $0x20]]  ;;  %v256_v24 = vstv %s913_s18  ;;  %1546 = vst [vmem:[#allocation19_spill] sm:$0xff] %v1033_v41  ;;  %1547 = vst [vmem:[#allocation20_spill] sm:$0xff] %v1042_v53  ;;  %v1046_v55 = vmul.f32 %v716_v12, %v213_v23  ;;  %v1048_v59 = vmul.f32 %v717_v13, %v213_v23 }
  0x30   :  { %s986_s30 = sld [smem:[#allocation2 + $0x21]]  ;;  %v299_v32 = vstv %s928_s23  ;;  %v1050_v0 = vmul.f32 %v716_v12, %v256_v24  ;;  %v1063_v53 = vmul.f32 %v717_v13, %v256_v24 }
  0x31   :  { %s995_s6 = sld [smem:[#allocation2 + $0x22]]  ;;  %v342_v50 = vstv %s937_s24  ;;  %v1065_v23 = vmul.f32 %v716_v12, %v299_v32  ;;  %v1070_v2 = vmul.f32 %v717_v13, %v299_v32 }
  0x32   :  { %s1003_s7 = sld [smem:[#allocation2 + $0x23]]  ;;  %v385_v49 = vstv %s945_s25  ;;  %v1072_v1 = vmul.f32 %v716_v12, %v342_v50  ;;  %v1074_v37 = vmul.f32 %v717_v13, %v342_v50 }
  0x33   :  { %s1018_s11 = sld [smem:[#allocation2 + $0x24]]  ;;  %v175_v8 = vstv %s954_s26  ;;  %1548 = vst [vmem:[#allocation21_spill] sm:$0xff] %v1065_v23  ;;  %1549 = vst [vmem:[#allocation22_spill] sm:$0xff] %v1070_v2  ;;  %v1080_v24 = vmul.f32 %v716_v12, %v385_v49  ;;  %v1082_v33 = vmul.f32 %v717_v13, %v385_v49  ;;  %v720_v12 = vld [vmem:[%s1529_s0 + $0x60] sm:$0xff]  ;;  %v721_v13 = vld [vmem:[%s1529_s0 + $0x68] sm:$0xff] }
  0x34   :  { %s1026_s13 = sld [smem:[#allocation2 + $0x25]]  ;;  %v218_v14 = vstv %s965_s28  ;;  %1550 = vst [vmem:[#allocation23_spill] sm:$0xff] %v1072_v1  ;;  %1551 = vst [vmem:[#allocation24_spill] sm:$0xff] %v1074_v37  ;;  %v1086_v62 = vmul.f32 %v718_v5, %v175_v8  ;;  %v1088_v32 = vmul.f32 %v719_v54, %v175_v8 }
  0x35   :  { %s1035_s14 = sld [smem:[#allocation2 + $0x26]]  ;;  %v261_v41 = vstv %s977_s29  ;;  %1552 = vst [vmem:[#allocation25_spill] sm:$0xff] %v1080_v24  ;;  %1553 = vst [vmem:[#allocation26_spill] sm:$0xff] %v1082_v33  ;;  %v1090_v26 = vmul.f32 %v718_v5, %v218_v14  ;;  %v1102_v33 = vmul.f32 %v719_v54, %v218_v14 }
  0x36   :  { %s1044_s15 = sld [smem:[#allocation2 + $0x27]]  ;;  %v304_v48 = vstv %s986_s30  ;;  %v1104_v8 = vmul.f32 %v718_v5, %v261_v41  ;;  %v1106_v24 = vmul.f32 %v719_v54, %v261_v41 }
  0x37   :  { %s1053_s16 = sld [smem:[#allocation2 + $0x28]]  ;;  %v347_v44 = vstv %s995_s6  ;;  %v1111_v1 = vmul.f32 %v718_v5, %v304_v48  ;;  %v1113_v25 = vmul.f32 %v719_v54, %v304_v48 }
  0x38   :  { %s1067_s20 = sld [smem:[#allocation2 + $0x29]]  ;;  %v390_v50 = vstv %s1003_s7  ;;  %v1115_v61 = vmul.f32 %v718_v5, %v347_v44  ;;  %v1121_v40 = vmul.f32 %v719_v54, %v347_v44 }
  0x39   :  { %s1076_s21 = sld [smem:[#allocation2 + $0x2a]]  ;;  %v180_v49 = vstv %s1018_s11  ;;  %1554 = vst [vmem:[#allocation27_spill] sm:$0xff] %v1111_v1  ;;  %1555 = vst [vmem:[#allocation28_spill] sm:$0xff] %v1113_v25  ;;  %v1123_v41 = vmul.f32 %v718_v5, %v390_v50  ;;  %v1132_v25 = vmul.f32 %v719_v54, %v390_v50  ;;  %v723_v54 = vld [vmem:[%s1529_s0 + $0x78] sm:$0xff] }
  0x3a   :  { %s1084_s22 = sld [smem:[#allocation2 + $0x2b]]  ;;  %v223_v37 = vstv %s1026_s13  ;;  %1556 = vst [vmem:[#allocation29_spill] sm:$0xff] %v1115_v61  ;;  %1557 = vst [vmem:[#allocation30_spill] sm:$0xff] %v1121_v40  ;;  %v1127_v22 = vmul.f32 %v720_v12, %v180_v49  ;;  %v1129_v21 = vmul.f32 %v721_v13, %v180_v49  ;;  %v722_v61 = vld [vmem:[%s1529_s0 + $0x70] sm:$0xff] }
  0x3b   :  { %s1093_s23 = sld [smem:[#allocation2 + $0x2c]]  ;;  %v266_v14 = vstv %s1035_s14  ;;  %1558 = vst [vmem:[#allocation31_spill] sm:$0xff] %v1123_v41  ;;  %1559 = vst [vmem:[#allocation32_spill] sm:$0xff] %v1132_v25  ;;  %v1140_v40 = vmul.f32 %v720_v12, %v223_v37  ;;  %v1142_v5 = vmul.f32 %v721_v13, %v223_v37 }
  0x3c   :  { %s1108_s27 = sld [smem:[#allocation2 + $0x2d]]  ;;  %v309_v43 = vstv %s1044_s15  ;;  %v1151_v49 = vmul.f32 %v720_v12, %v266_v14  ;;  %v1153_v25 = vmul.f32 %v721_v13, %v266_v14 }
  0x3d   :  { %s1117_s28 = sld [smem:[#allocation2 + $0x2e]]  ;;  %v352_v48 = vstv %s1053_s16  ;;  %1560 = vst [vmem:[#allocation33_spill] sm:$0xff] %v1140_v40  ;;  %1561 = vst [vmem:[#allocation34_spill] sm:$0xff] %v1142_v5  ;;  %v1155_v1 = vmul.f32 %v720_v12, %v309_v43  ;;  %v1160_v37 = vmul.f32 %v721_v13, %v309_v43 }
  0x3e   :  { %s1125_s4 = sld [smem:[#allocation2 + $0x2f]]  ;;  %v395_v41 = vstv %s1067_s20  ;;  %1562 = vst [vmem:[#allocation35_spill] sm:$0xff] %v1151_v49  ;;  %1563 = vst [vmem:[#allocation36_spill] sm:$0xff] %v1153_v25  ;;  %v1162_v23 = vmul.f32 %v720_v12, %v352_v48  ;;  %v1164_v5 = vmul.f32 %v721_v13, %v352_v48 }
  0x3f   :  { %s1134_s5 = sld [smem:[#allocation2 + $0x30]]  ;;  %v185_v44 = vstv %s1076_s21  ;;  %1564 = vst [vmem:[#allocation37_spill] sm:$0xff] %v1155_v1  ;;  %1565 = vst [vmem:[#allocation38_spill] sm:$0xff] %v1160_v37  ;;  %v1171_v25 = vmul.f32 %v720_v12, %v395_v41  ;;  %v1173_v49 = vmul.f32 %v721_v13, %v395_v41 }
  0x40   :  { %s1145_s6 = sld [smem:[#allocation2 + $0x31]]  ;;  %v228_v50 = vstv %s1084_s22  ;;  %1566 = vst [vmem:[#allocation39_spill] sm:$0xff] %v1162_v23  ;;  %1567 = vst [vmem:[#allocation40_spill] sm:$0xff] %v1164_v5  ;;  %v1168_v40 = vmul.f32 %v722_v61, %v185_v44  ;;  %v1177_v43 = vmul.f32 %v723_v54, %v185_v44 }
  0x41   :  { %s1157_s9 = sld [smem:[#allocation2 + $0x32]]  ;;  %v271_v2 = vstv %s1093_s23  ;;  %1569 = vst [vmem:[#allocation42_spill] sm:$0xff] %v1171_v25  ;;  %1570 = vst [vmem:[#allocation43_spill] sm:$0xff] %v1173_v49  ;;  %v1179_v37 = vmul.f32 %v722_v61, %v228_v50  ;;  %v1181_v23 = vmul.f32 %v723_v54, %v228_v50 }
  0x42   :  { %s1166_s0 = sld [smem:[#allocation2 + $0x33]]  ;;  %1568 = vst [vmem:[#allocation41_spill] sm:$0xff] %v1168_v40  ;;  %v314_v14 = vstv %s1108_s27  ;;  %v1184_v5 = vmul.f32 %v722_v61, %v271_v2  ;;  %v1186_v1 = vmul.f32 %v723_v54, %v271_v2 }
  0x43   :  { %s1175_s10 = sld [smem:[#allocation2 + $0x34]]  ;;  %1571 = vst [vmem:[#allocation44_spill] sm:$0xff] %v1181_v23  ;;  %v357_v48 = vstv %s1117_s28  ;;  %v1188_v40 = vmul.f32 %v722_v61, %v314_v14  ;;  %v1192_v41 = vmul.f32 %v723_v54, %v314_v14 }
  0x44   :  { %1572 = vst [vmem:[#allocation45_spill] sm:$0xff] %v1184_v5  ;;  %1573 = vst [vmem:[#allocation46_spill] sm:$0xff] %v1186_v1  ;;  %v400_v12 = vstv %s1125_s4  ;;  %v1194_v49 = vmul.f32 %v722_v61, %v357_v48  ;;  %v1196_v44 = vmul.f32 %v723_v54, %v357_v48  ;;  %s1220_s12 = sld [smem:[#allocation2 + $0x35]] }
  0x45   :  { %1574 = vst [vmem:[#allocation47_spill] sm:$0xff] %v1188_v40  ;;  %v152_v13 = vstv %s1134_s5  ;;  %v1201_v5 = vmul.f32 %v722_v61, %v400_v12  ;;  %v1206_v14 = vmul.f32 %v723_v54, %v400_v12  ;;  %s1226_s11 = sld [smem:[#allocation2 + $0x36]] }
  0x46   :  { %1575 = vst [vmem:[#allocation48_spill] sm:$0xff] %v1194_v49  ;;  %1576 = vst [vmem:[#allocation49_spill] sm:$0xff] %v1196_v44  ;;  %v153_v50 = vadd.f32 %v152_v13, %v859_v6  ;;  %v154_v25 = vadd.f32 %v152_v13, %v861_v7  ;;  %v195_v23 = vstv %s1145_s6  ;;  %s1232_s13 = sld [smem:[#allocation2 + $0x37]] }
  0x47   :  { %1577 = vst [vmem:[#allocation50_spill] sm:$0xff] %v1201_v5  ;;  %v196_v2 = vadd.f32 %v195_v23, %v866_v9  ;;  %v197_v40 = vadd.f32 %v195_v23, %v868_v10  ;;  %v238_v1 = vstv %s1157_s9  ;;  %s1238_s14 = sld [smem:[#allocation2 + $0x38]] }
  0x48   :  { %v158_v49 = vadd.f32 %v906_v27, %v153_v50  ;;  %v159_v48 = vadd.f32 %v908_v28, %v154_v25  ;;  %v239_v44 = vadd.f32 %v238_v1, %v870_v11  ;;  %v240_v6 = vadd.f32 %v238_v1, %v883_v17  ;;  %s1244_s15 = sld [smem:[#allocation2 + $0x3a]] }
  0x49   :  { %v201_v7 = vadd.f32 %v910_v29, %v196_v2  ;;  %v202_v61 = vadd.f32 %v922_v34, %v197_v40  ;;  %v281_v13 = vstv %s1166_s0  ;;  %v324_v5 = vstv %s1175_s10  ;;  %s1250_s16 = sld [smem:[#allocation2 + $0x3b]] }
  0x4a   :  { %v163_v9 = vadd.f32 %v947_v45, %v158_v49  ;;  %v164_v10 = vadd.f32 %v949_v46, %v159_v48  ;;  %v244_v23 = vadd.f32 %v924_v35, %v239_v44  ;;  %v245_v27 = vadd.f32 %v926_v36, %v240_v6  ;;  %s1256_s17 = sld [smem:[#allocation2 + $0x3c]]  ;;  %v1585_v50 = vld [vmem:[#allocation44_spill] sm:$0xff]  ;;  %v1586_v48 = vld [vmem:[#allocation27_spill] sm:$0xff] }
  0x4b   :  { %v206_v11 = vadd.f32 %v960_v51, %v201_v7  ;;  %v207_v17 = vadd.f32 %v962_v52, %v202_v61  ;;  %v282_v25 = vadd.f32 %v281_v13, %v885_v18  ;;  %v283_v28 = vadd.f32 %v281_v13, %v890_v20  ;;  %s1262_s1 = sld [smem:[#allocation2 + $0x3e]]  ;;  %v1587_v7 = vld [vmem:[#allocation28_spill] sm:$0xff] }
  0x4c   :  { %v168_v29 = vadd.f32 %v988_v63, %v163_v9  ;;  %v169_v34 = vadd.f32 %v997_v3, %v164_v10  ;;  %v249_v35 = vadd.f32 %v971_v56, %v244_v23  ;;  %v250_v36 = vadd.f32 %v973_v57, %v245_v27  ;;  %s1268_s18 = sld [smem:[#allocation2 + $0x3f]]  ;;  %v1589_v9 = vld [vmem:[#allocation46_spill] sm:$0xff]  ;;  %v1590_v23 = vld [vmem:[#allocation5_spill] sm:$0xff] }
  0x4d   :  { %v211_v40 = vadd.f32 %v999_v4, %v206_v11  ;;  %v212_v45 = vadd.f32 %v1012_v15, %v207_v17  ;;  %v287_v18 = vadd.f32 %v931_v38, %v282_v25  ;;  %v288_v20 = vadd.f32 %v933_v39, %v283_v28  ;;  %s1274_s19 = sld [smem:[#allocation2 + $0x42]]  ;;  %v1592_v17 = vld [vmem:[#allocation38_spill] sm:$0xff] }
  0x4e   :  { %v173_v46 = vadd.f32 %v1037_v42, %v168_v29  ;;  %v174_v51 = vadd.f32 %v1039_v47, %v169_v34  ;;  %v254_v52 = vadd.f32 %v1014_v16, %v249_v35  ;;  %v255_v56 = vadd.f32 %v1016_v19, %v250_v36  ;;  %s1280_s20 = sld [smem:[#allocation2 + $0x46]]  ;;  %v1593_v28 = vld [vmem:[#allocation6_spill] sm:$0xff]  ;;  %v1594_v34 = vld [vmem:[#allocation9_spill] sm:$0xff] }
  0x4f   :  { %v216_v57 = vadd.f32 %v1046_v55, %v211_v40  ;;  %v217_v63 = vadd.f32 %v1048_v59, %v212_v45  ;;  %v292_v38 = vadd.f32 %v975_v58, %v287_v18  ;;  %v293_v39 = vadd.f32 %v980_v60, %v288_v20  ;;  %v1578_v55 = vld [vmem:[#allocation33_spill] sm:$0xff]  ;;  %v1579_v59 = vld [vmem:[#allocation34_spill] sm:$0xff]  ;;  %s1286_s21 = sld [smem:[#allocation2 + $0x40]]  ;;  %v1595_v45 = vld [vmem:[#allocation47_spill] sm:$0xff] }
  0x50   :  { %v178_v1 = vadd.f32 %v1086_v62, %v173_v46  ;;  %v179_v3 = vadd.f32 %v1088_v32, %v174_v51  ;;  %v259_v4 = vadd.f32 %v1050_v0, %v254_v52  ;;  %v260_v15 = vadd.f32 %v1063_v53, %v255_v56  ;;  %v1580_v0 = vld [vmem:[#allocation21_spill] sm:$0xff]  ;;  %v1581_v32 = vld [vmem:[#allocation22_spill] sm:$0xff]  ;;  %s1293_s22 = sld [smem:[#allocation2 + $0x43]]  ;;  %v1598_v56 = vld [vmem:[#allocation7_spill] sm:$0xff] }
  0x51   :  { %v221_v16 = vadd.f32 %v1090_v26, %v216_v57  ;;  %v222_v19 = vadd.f32 %v1102_v33, %v217_v63  ;;  %v297_v58 = vadd.f32 %v1022_v30, %v292_v38  ;;  %v298_v60 = vadd.f32 %v1024_v31, %v293_v39  ;;  %s1300_s23 = sld [smem:[#allocation2 + $0x47]]  ;;  %v1596_v46 = vld [vmem:[#allocation10_spill] sm:$0xff]  ;;  %v1599_v63 = vld [vmem:[#allocation8_spill] sm:$0xff] }
  0x52   :  { %v183_v62 = vadd.f32 %v1127_v22, %v178_v1  ;;  %v184_v42 = vadd.f32 %v1129_v21, %v179_v3  ;;  %v264_v47 = vadd.f32 %v1104_v8, %v259_v4  ;;  %v265_v53 = vadd.f32 %v1106_v24, %v260_v15  ;;  %v1582_v22 = vld [vmem:[#allocation41_spill] sm:$0xff]  ;;  %v1583_v8 = vld [vmem:[#allocation35_spill] sm:$0xff]  ;;  %v1584_v24 = vld [vmem:[#allocation36_spill] sm:$0xff]  ;;  %s1305_s24 = sld [smem:[#allocation2 + $0x4a]] }
  0x53   :  { %v226_v26 = vadd.f32 %v1578_v55, %v221_v16  ;;  %v227_v33 = vadd.f32 %v1579_v59, %v222_v19  ;;  %v302_v30 = vadd.f32 %v1580_v0, %v297_v58  ;;  %v303_v31 = vadd.f32 %v1581_v32, %v298_v60  ;;  %s1310_s25 = sld [smem:[#allocation2 + $0x4b]]  ;;  %v1600_v39 = vld [vmem:[#allocation14_spill] sm:$0xff]  ;;  %v1601_v4 = vld [vmem:[#allocation17_spill] sm:$0xff]  ;;  %v1602_v16 = vld [vmem:[#allocation11_spill] sm:$0xff] }
  0x54   :  { %v188_v54 = vadd.f32 %v1582_v22, %v183_v62  ;;  %v189_v21 = vadd.f32 %v1177_v43, %v184_v42  ;;  %v269_v49 = vadd.f32 %v1583_v8, %v264_v47  ;;  %v270_v12 = vadd.f32 %v1584_v24, %v265_v53  ;;  %v1588_v43 = vld [vmem:[#allocation45_spill] sm:$0xff]  ;;  %s1315_s26 = sld [smem:[#allocation2 + $0x44]]  ;;  %v1603_v58 = vld [vmem:[#allocation12_spill] sm:$0xff]  ;;  %v1604_v62 = vld [vmem:[#allocation18_spill] sm:$0xff] }
  0x55   :  { %v231_v44 = vadd.f32 %v1179_v37, %v226_v26  ;;  %v232_v2 = vadd.f32 %v1585_v50, %v227_v33  ;;  %v307_v6 = vadd.f32 %v1586_v48, %v302_v30  ;;  %v308_v61 = vadd.f32 %v1587_v7, %v303_v31  ;;  %v1591_v37 = vld [vmem:[#allocation37_spill] sm:$0xff]  ;;  %s1323_s3 = sld [smem:[#allocation2 + $0x4e]]  ;;  %v1605_v55 = vld [vmem:[#allocation23_spill] sm:$0xff]  ;;  %v1607_v0 = vld [vmem:[#allocation16_spill] sm:$0xff] }
  0x56   :  { %725 = vtanh.f32 %v188_v54  ;;  %v274_v13 = vadd.f32 %v1588_v43, %v269_v49  ;;  %v275_v10 = vadd.f32 %v1589_v9, %v270_v12  ;;  %v325_v27 = vadd.f32 %v324_v5, %v1590_v23  ;;  %v1606_v59 = vld [vmem:[#allocation15_spill] sm:$0xff]  ;;  %v1608_v31 = vld [vmem:[#allocation24_spill] sm:$0xff]  ;;  %s1336_s27 = sld [smem:[#allocation2 + $0x4f]]  ;;  %v1609_v49 = vld [vmem:[#allocation29_spill] sm:$0xff] }
  0x57   :  { %727 = vtanh.f32 %v189_v21  ;;  %v312_v11 = vadd.f32 %v1591_v37, %v307_v6  ;;  %v313_v25 = vadd.f32 %v1592_v17, %v308_v61  ;;  %v326_v29 = vadd.f32 %v324_v5, %v1593_v28  ;;  %v1597_v5 = vld [vmem:[#allocation13_spill] sm:$0xff]  ;;  %v1610_v12 = vld [vmem:[#allocation19_spill] sm:$0xff]  ;;  %v1611_v50 = vld [vmem:[#allocation20_spill] sm:$0xff]  ;;  %s1364_s28 = sld [smem:[#allocation2 + $0x39]] }
  0x58   :  { %729 = vtanh.f32 %v231_v44  ;;  %v330_v35 = vadd.f32 %v1594_v34, %v325_v27  ;;  %v367_v36 = vstv %s1220_s12  ;;  %v407_v40 = vstv %s1226_s11  ;;  %v1612_v6 = vld [vmem:[#allocation30_spill] sm:$0xff]  ;;  %v1613_v9 = vld [vmem:[#allocation39_spill] sm:$0xff]  ;;  %v1614_v23 = vld [vmem:[#allocation25_spill] sm:$0xff]  ;;  %s1372_s4 = sld [smem:[#allocation2 + $0x3d]] }
  0x59   :  { %731 = vtanh.f32 %v232_v2  ;;  %v317_v18 = vadd.f32 %v1595_v45, %v312_v11  ;;  %v318_v20 = vadd.f32 %v1192_v41, %v313_v25  ;;  %v331_v51 = vadd.f32 %v1596_v46, %v326_v29  ;;  %v1615_v37 = vld [vmem:[#allocation26_spill] sm:$0xff]  ;;  %v1616_v28 = vld [vmem:[#allocation40_spill] sm:$0xff]  ;;  %v1618_v46 = vld [vmem:[#allocation31_spill] sm:$0xff]  ;;  %s1378_s5 = sld [smem:[#allocation2 + $0x50]] }
  0x5a   :  { %733 = vtanh.f32 %v274_v13  ;;  %v335_v52 = vadd.f32 %v1597_v5, %v330_v35  ;;  %v368_v57 = vadd.f32 %v367_v36, %v1598_v56  ;;  %v369_v38 = vadd.f32 %v367_v36, %v1599_v63  ;;  %v1619_v5 = vld [vmem:[#allocation32_spill] sm:$0xff]  ;;  %v1620_v63 = vld [vmem:[#allocation49_spill] sm:$0xff]  ;;  %s1384_s29 = sld [smem:[#allocation2 + $0x41]] }
  0x5b   :  { %735 = vtanh.f32 %v275_v10  ;;  %v336_v1 = vadd.f32 %v1600_v39, %v331_v51  ;;  %v413_v41 = vstv %s1244_s15  ;;  %v418_v3 = vstv %s1262_s1  ;;  %s1394_s30 = sld [smem:[#allocation2 + $0x48]] }
  0x5c   :  { %737 = vtanh.f32 %v317_v18  ;;  %v340_v15 = vadd.f32 %v1601_v4, %v335_v52  ;;  %v373_v19 = vadd.f32 %v1602_v16, %v368_v57  ;;  %v374_v60 = vadd.f32 %v1603_v58, %v369_v38  ;;  %v1617_v18 = vld [vmem:[#allocation48_spill] sm:$0xff]  ;;  %v1621_v16 = vld [vmem:[#allocation42_spill] sm:$0xff]  ;;  %v1622_v58 = vld [vmem:[#allocation43_spill] sm:$0xff]  ;;  %s1401_s6 = sld [smem:[#allocation2 + $0x4c]] }
  0x5d   :  { %739 = vtanh.f32 %v318_v20  ;;  %v341_v42 = vadd.f32 %v1604_v62, %v336_v1  ;;  %v423_v47 = vstv %s1274_s19  ;;  %v428_v53 = vstv %s1280_s20  ;;  %s1409_s7 = sld [smem:[#allocation2 + $0x51]] }
  0x5e   :  { %v345_v26 = vadd.f32 %v1605_v55, %v340_v15  ;;  %v378_v33 = vadd.f32 %v1606_v59, %v373_v19  ;;  %v379_v30 = vadd.f32 %v1607_v0, %v374_v60  ;;  %v440_v32 = vstv %s1232_s13  ;;  %s1460_s8 = sld [smem:[#allocation2 + $0x45]] }
  0x5f   :  { %v346_v22 = vadd.f32 %v1608_v31, %v341_v42  ;;  %v433_v54 = vstv %s1305_s24  ;;  %v446_v21 = vstv %s1250_s16  ;;  %v451_v8 = vstv %s1268_s18  ;;  %s1466_s9 = sld [smem:[#allocation2 + $0x49]] }
  0x60   :  { %v350_v24 = vadd.f32 %v1609_v49, %v345_v26  ;;  %v383_v44 = vadd.f32 %v1610_v12, %v378_v33  ;;  %v384_v2 = vadd.f32 %v1611_v50, %v379_v30  ;;  %v456_v48 = vstv %s1293_s22  ;;  %v1623_v33 = vld [vmem:[#allocation50_spill] sm:$0xff]  ;;  %s1474_s0 = sld [smem:[#allocation2 + $0x4d]] }
  0x61   :  { %v351_v7 = vadd.f32 %v1612_v6, %v346_v22  ;;  %v461_v61 = vstv %s1300_s23  ;;  %v466_v43 = vstv %s1310_s25  ;;  %v473_v13 = vstv %s1238_s14  ;;  %s1484_s10 = sld [smem:[#allocation2 + $0x52]] }
  0x62   :  { %v355_v10 = vadd.f32 %v1613_v9, %v350_v24  ;;  %v388_v27 = vadd.f32 %v1614_v23, %v383_v44  ;;  %v389_v11 = vadd.f32 %v1615_v37, %v384_v2  ;;  %v479_v17 = vstv %s1256_s17  ;;  %s1489_s12 = sld [smem:[#allocation2 + $0x53]] }
  0x63   :  { %v1350_v25 = vpop.eup %725  ;;  %v356_v29 = vadd.f32 %v1616_v28, %v351_v7  ;;  %v410_v34 = vstv %s1323_s3  ;;  %v484_v35 = vstv %s1286_s21  ;;  %v489_v36 = vstv %s1315_s26  ;;  %s1494_s11 = sld [smem:[#allocation2 + $0x54]] }
  0x64   :  { %v1356_v45 = vpop.eup %727  ;;  %v360_v20 = vadd.f32 %v1617_v18, %v355_v10  ;;  %v393_v51 = vadd.f32 %v1618_v46, %v388_v27  ;;  %v394_v52 = vadd.f32 %v1619_v5, %v389_v11  ;;  %v408_v56 = vmul.f32 %v1350_v25, %v407_v40  ;;  %s1497_s13 = sld [smem:[#allocation2 + $0x55]] }
  0x65   :  { %v1362_v57 = vpop.eup %729  ;;  %v361_v38 = vadd.f32 %v1620_v63, %v356_v29  ;;  %v409_v39 = vmul.f32 %v1356_v45, %v407_v40  ;;  %v441_v1 = vmul.f32 %v1350_v25, %v440_v32  ;;  %v442_v4 = vmul.f32 %v1356_v45, %v440_v32  ;;  %s1500_s14 = sld [smem:[#allocation2 + $0x5a]] }
  0x66   :  { %v1370_v15 = vpop.eup %731  ;;  %741 = vtanh.f32 %v360_v20  ;;  %v398_v19 = vadd.f32 %v1621_v16, %v393_v51  ;;  %v399_v60 = vadd.f32 %v1622_v58, %v394_v52  ;;  %v411_v62 = vadd.f32 %v410_v34, %v408_v56  ;;  %s1503_s15 = sld [smem:[#allocation2 + $0x5b]] }
  0x67   :  { %v1376_v42 = vpop.eup %733  ;;  %743 = vtanh.f32 %v361_v38  ;;  %v412_v40 = vadd.f32 %v410_v34, %v409_v39  ;;  %v414_v55 = vmul.f32 %v1362_v57, %v413_v41  ;;  %v415_v26 = vmul.f32 %v1370_v15, %v413_v41  ;;  %s1505_s16 = sld [smem:[#allocation2 + $0x56]] }
  0x68   :  { %v1382_v59 = vpop.eup %735  ;;  %v403_v0 = vadd.f32 %v1623_v33, %v398_v19  ;;  %v404_v30 = vadd.f32 %v1206_v14, %v399_v60  ;;  %v419_v32 = vmul.f32 %v1376_v42, %v418_v3  ;;  %v443_v31 = vstv %s1336_s27  ;;  %s1507_s17 = sld [smem:[#allocation2 + $0x57]] }
  0x69   :  { %v1392_v22 = vpop.eup %737  ;;  %v416_v41 = vadd.f32 %v414_v55, %v411_v62  ;;  %v417_v49 = vadd.f32 %v415_v26, %v412_v40  ;;  %v420_v24 = vmul.f32 %v1382_v59, %v418_v3  ;;  %v444_v12 = vadd.f32 %v443_v31, %v441_v1  ;;  %s1515_s1 = sld [smem:[#allocation2 + $0x58]] }
  0x6a   :  { %v1399_v44 = vpop.eup %739  ;;  %745 = vtanh.f32 %v403_v0  ;;  %v424_v14 = vmul.f32 %v1392_v22, %v423_v47  ;;  %v445_v50 = vadd.f32 %v443_v31, %v442_v4  ;;  %v447_v2 = vmul.f32 %v1362_v57, %v446_v21  ;;  %s1517_s18 = sld [smem:[#allocation2 + $0x59]] }
  0x6b   :  { %747 = vtanh.f32 %v404_v30  ;;  %v421_v3 = vadd.f32 %v419_v32, %v416_v41  ;;  %v422_v6 = vadd.f32 %v420_v24, %v417_v49  ;;  %v425_v7 = vmul.f32 %v1399_v44, %v423_v47  ;;  %s707_s19 = sld [smem:[#allocation2 + $0x5c]] }
  0x6c   :  { %v448_v9 = vmul.f32 %v1370_v15, %v446_v21  ;;  %v449_v10 = vadd.f32 %v447_v2, %v444_v12  ;;  %v452_v23 = vmul.f32 %v1376_v42, %v451_v8  ;;  %v453_v27 = vmul.f32 %v1382_v59, %v451_v8  ;;  %s708_s20 = sld [smem:[#allocation2 + $0x5d]] }
  0x6d   :  { %v426_v37 = vadd.f32 %v424_v14, %v421_v3  ;;  %v427_v11 = vadd.f32 %v425_v7, %v422_v6  ;;  %v457_v28 = vmul.f32 %v1392_v22, %v456_v48  ;;  %v458_v47 = vmul.f32 %v1399_v44, %v456_v48  ;;  %s709_s21 = sld [smem:[#allocation2 + $0x5e]] }
  0x6e   :  { %v450_v21 = vadd.f32 %v448_v9, %v445_v50  ;;  %v454_v29 = vadd.f32 %v452_v23, %v449_v10  ;;  %v474_v34 = vmul.f32 %v1350_v25, %v473_v13  ;;  %v475_v8 = vmul.f32 %v1356_v45, %v473_v13 }
  0x6f   :  { %v476_v18 = vstv %s1378_s5  ;;  %v480_v20 = vmul.f32 %v1362_v57, %v479_v17  ;;  %v481_v46 = vmul.f32 %v1370_v15, %v479_v17  ;;  %v485_v48 = vmul.f32 %v1376_v42, %v484_v35 }
  0x70   :  { %v455_v51 = vadd.f32 %v453_v27, %v450_v21  ;;  %v459_v5 = vadd.f32 %v457_v28, %v454_v29  ;;  %v477_v52 = vadd.f32 %v476_v18, %v474_v34  ;;  %v478_v56 = vadd.f32 %v476_v18, %v475_v8 }
  0x71   :  { %v486_v13 = vmul.f32 %v1382_v59, %v484_v35  ;;  %v490_v63 = vmul.f32 %v1392_v22, %v489_v36  ;;  %v491_v17 = vmul.f32 %v1399_v44, %v489_v36  ;;  %v494_v38 = vstv %s1394_s30 }
  0x72   :  { %v460_v39 = vadd.f32 %v458_v47, %v455_v51  ;;  %v482_v1 = vadd.f32 %v480_v20, %v477_v52  ;;  %v483_v4 = vadd.f32 %v481_v46, %v478_v56  ;;  %v499_v16 = vstv %s1401_s6 }
  0x73   :  { %v742_v19 = vpop.eup %741  ;;  %v506_v58 = vstv %s1364_s28  ;;  %v509_v60 = vstv %s1409_s7  ;;  %v512_v62 = vstv %s1372_s4  ;;  %v517_v40 = vstv %s1384_s29 }
  0x74   :  { %v744_v35 = vpop.eup %743  ;;  %v429_v55 = vmul.f32 %v742_v19, %v428_v53  ;;  %v462_v26 = vmul.f32 %v742_v19, %v461_v61  ;;  %v487_v36 = vadd.f32 %v485_v48, %v482_v1  ;;  %v488_v33 = vadd.f32 %v486_v13, %v483_v4 }
  0x75   :  { %v430_v0 = vmul.f32 %v744_v35, %v428_v53  ;;  %v463_v30 = vmul.f32 %v744_v35, %v461_v61  ;;  %v495_v32 = vmul.f32 %v742_v19, %v494_v38  ;;  %v496_v31 = vmul.f32 %v744_v35, %v494_v38 }
  0x76   :  { %v431_v41 = vadd.f32 %v429_v55, %v426_v37  ;;  %v464_v49 = vadd.f32 %v462_v26, %v459_v5  ;;  %v492_v24 = vadd.f32 %v490_v63, %v487_v36  ;;  %v493_v12 = vadd.f32 %v491_v17, %v488_v33 }
  0x77   :  { %v746_v14 = vpop.eup %745  ;;  %v432_v50 = vadd.f32 %v430_v0, %v427_v11  ;;  %v465_v2 = vadd.f32 %v463_v30, %v460_v39  ;;  %v507_v3 = vmul.f32 %v1350_v25, %v506_v58  ;;  %v508_v6 = vmul.f32 %v1356_v45, %v506_v58 }
  0x78   :  { %v748_v7 = vpop.eup %747  ;;  %v434_v53 = vmul.f32 %v746_v14, %v433_v54  ;;  %v467_v61 = vmul.f32 %v746_v14, %v466_v43  ;;  %v497_v9 = vadd.f32 %v495_v32, %v492_v24  ;;  %v498_v10 = vadd.f32 %v496_v31, %v493_v12 }
  0x79   :  { %v435_v23 = vmul.f32 %v748_v7, %v433_v54  ;;  %v468_v27 = vmul.f32 %v748_v7, %v466_v43  ;;  %v500_v37 = vmul.f32 %v746_v14, %v499_v16  ;;  %v501_v11 = vmul.f32 %v748_v7, %v499_v16 }
  0x7a   :  { %v436_v28 = vadd.f32 %v434_v53, %v431_v41  ;;  %v469_v25 = vadd.f32 %v467_v61, %v464_v49  ;;  %v510_v45 = vadd.f32 %v509_v60, %v507_v3  ;;  %v511_v47 = vadd.f32 %v509_v60, %v508_v6 }
  0x7b   :  { %v437_v21 = vadd.f32 %v435_v23, %v432_v50  ;;  %v470_v29 = vadd.f32 %v468_v27, %v465_v2  ;;  %v502_v34 = vadd.f32 %v500_v37, %v497_v9  ;;  %v503_v8 = vadd.f32 %v501_v11, %v498_v10 }
  0x7c   :  { %749 = vtanh.f32 %v436_v28  ;;  %v513_v18 = vmul.f32 %v1362_v57, %v512_v62  ;;  %v514_v54 = vmul.f32 %v1370_v15, %v512_v62  ;;  %v518_v43 = vmul.f32 %v1376_v42, %v517_v40 }
  0x7d   :  { %751 = vtanh.f32 %v437_v21  ;;  %v519_v20 = vmul.f32 %v1382_v59, %v517_v40  ;;  %v522_v46 = vstv %s1460_s8  ;;  %v527_v48 = vstv %s1466_s9 }
  0x7e   :  { %753 = vtanh.f32 %v469_v25  ;;  %v515_v51 = vadd.f32 %v513_v18, %v510_v45  ;;  %v516_v5 = vadd.f32 %v514_v54, %v511_v47  ;;  %v523_v52 = vmul.f32 %v1392_v22, %v522_v46 }
  0x7f   :  { %755 = vtanh.f32 %v470_v29  ;;  %v524_v57 = vmul.f32 %v1399_v44, %v522_v46  ;;  %v528_v15 = vmul.f32 %v742_v19, %v527_v48  ;;  %v529_v42 = vmul.f32 %v744_v35, %v527_v48 }
  0x80   :  { %757 = vtanh.f32 %v502_v34  ;;  %v520_v59 = vadd.f32 %v518_v43, %v515_v51  ;;  %v521_v56 = vadd.f32 %v519_v20, %v516_v5  ;;  %v532_v13 = vstv %s1474_s0 }
  0x81   :  { %759 = vtanh.f32 %v503_v8  ;;  %v533_v63 = vmul.f32 %v746_v14, %v532_v13  ;;  %v534_v17 = vmul.f32 %v748_v7, %v532_v13  ;;  %v539_v16 = vstv %s1484_s10 }
  0x82   :  { %v525_v22 = vadd.f32 %v523_v52, %v520_v59  ;;  %v526_v44 = vadd.f32 %v524_v57, %v521_v56  ;;  %v562_v19 = vstv %s1489_s12  ;;  %v542_v58 = vstv %s1500_s14 }
  0x83   :  { %v545_v62 = vstv %s1494_s11  ;;  %v565_v40 = vstv %s1503_s15  ;;  %v568_v35 = vstv %s1497_s13  ;;  %v550_v30 = vstv %s1505_s16 }
  0x84   :  { %v530_v38 = vadd.f32 %v528_v15, %v525_v22  ;;  %v531_v39 = vadd.f32 %v529_v42, %v526_v44  ;;  %v573_v31 = vstv %s1507_s17  ;;  %v555_v25 = vstv %s1515_s1 }
  0x85   :  { %v578_v45 = vstv %s1517_s18  ;;  %v585_v57 = vstv %s707_s19  ;;  %v588_v42 = vstv %s709_s21  ;;  %v591_v59 = vstv %s708_s20 }
  0x86   :  { %v535_v1 = vadd.f32 %v533_v63, %v530_v38  ;;  %v536_v4 = vadd.f32 %v534_v17, %v531_v39 }
  0x88   :  { %761 = vtanh.f32 %v535_v1 }
  0x89   :  { %v750_v60 = vpop.eup %749  ;;  %763 = vtanh.f32 %v536_v4 }
  0x8a   :  { %v752_v55 = vpop.eup %751  ;;  %v540_v26 = vmul.f32 %v750_v60, %v539_v16  ;;  %v563_v36 = vmul.f32 %v750_v60, %v562_v19 }
  0x8b   :  { %v754_v33 = vpop.eup %753  ;;  %v541_v0 = vmul.f32 %v752_v55, %v539_v16  ;;  %v564_v32 = vmul.f32 %v752_v55, %v562_v19 }
  0x8c   :  { %v756_v41 = vpop.eup %755  ;;  %v543_v49 = vadd.f32 %v542_v58, %v540_v26  ;;  %v546_v24 = vmul.f32 %v754_v33, %v545_v62  ;;  %v566_v12 = vadd.f32 %v565_v40, %v563_v36  ;;  %v569_v14 = vmul.f32 %v754_v33, %v568_v35 }
  0x8d   :  { %v758_v50 = vpop.eup %757  ;;  %v544_v2 = vadd.f32 %v542_v58, %v541_v0  ;;  %v547_v3 = vmul.f32 %v756_v41, %v545_v62  ;;  %v567_v6 = vadd.f32 %v565_v40, %v564_v32  ;;  %v570_v7 = vmul.f32 %v756_v41, %v568_v35 }
  0x8e   :  { %v760_v53 = vpop.eup %759  ;;  %v548_v61 = vadd.f32 %v546_v24, %v543_v49  ;;  %v551_v9 = vmul.f32 %v758_v50, %v550_v30  ;;  %v571_v10 = vadd.f32 %v569_v14, %v566_v12  ;;  %v574_v23 = vmul.f32 %v758_v50, %v573_v31 }
  0x8f   :  { %v549_v27 = vadd.f32 %v547_v3, %v544_v2  ;;  %v552_v37 = vmul.f32 %v760_v53, %v550_v30  ;;  %v572_v11 = vadd.f32 %v570_v7, %v567_v6  ;;  %v575_v28 = vmul.f32 %v760_v53, %v573_v31 }
  0x90   :  { %v553_v47 = vadd.f32 %v551_v9, %v548_v61  ;;  %v576_v21 = vadd.f32 %v574_v23, %v571_v10 }
  0x91   :  { %v554_v34 = vadd.f32 %v552_v37, %v549_v27  ;;  %v577_v8 = vadd.f32 %v575_v28, %v572_v11 }
  0x95   :  { %v762_v29 = vpop.eup %761 }
  0x96   :  { %v764_v18 = vpop.eup %763  ;;  %v556_v54 = vmul.f32 %v762_v29, %v555_v25  ;;  %v579_v43 = vmul.f32 %v762_v29, %v578_v45 }
  0x97   :  { %v557_v20 = vmul.f32 %v764_v18, %v555_v25  ;;  %v580_v46 = vmul.f32 %v764_v18, %v578_v45 }
  0x98   :  { %v558_v48 = vadd.f32 %v556_v54, %v553_v47  ;;  %v581_v51 = vadd.f32 %v579_v43, %v576_v21 }
  0x99   :  { %v559_v5 = vadd.f32 %v557_v20, %v554_v34  ;;  %v582_v52 = vadd.f32 %v580_v46, %v577_v8 }
  0x9a   :  { %765 = vtanh.f32 %v558_v48 }
  0x9b   :  { %767 = vtanh.f32 %v559_v5 }
  0x9c   :  { %769 = vtanh.f32 %v581_v51 }
  0x9d   :  { %771 = vtanh.f32 %v582_v52 }
  0xa7   :  { %v766_v15 = vpop.eup %765 }
  0xa8   :  { %v768_v56 = vpop.eup %767  ;;  %v586_v13 = vmul.f32 %v766_v15, %v585_v57 }
  0xa9   :  { %v770_v22 = vpop.eup %769  ;;  %v587_v44 = vmul.f32 %v768_v56, %v585_v57 }
  0xaa   :  { %v772_v63 = vpop.eup %771  ;;  %v589_v17 = vadd.f32 %v588_v42, %v586_v13  ;;  %v592_v38 = vmul.f32 %v770_v22, %v591_v59 }
  0xab   :  { %v590_v39 = vadd.f32 %v588_v42, %v587_v44  ;;  %v593_v1 = vmul.f32 %v772_v63, %v591_v59 }
  0xac   :  { %v594_v4 = vadd.f32 %v592_v38, %v589_v17 }
  0xad   :  { %v595_v16 = vadd.f32 %v593_v1, %v590_v39 }
  0xae   :  { %773 = vtanh.f32 %v594_v4 }
  0xaf   :  { %775 = vtanh.f32 %v595_v16 }
  0xbb   :  { %v774_v19 = vpop.eup %773 }
  0xbc   :  { %v776_v58 = vpop.eup %775  ;;  %v598_v60 = vmul.f32 0.5, %v774_v19 }
  0xbd   :  { %v599_v62 = vmul.f32 0.5, %v776_v58 }
  0xbe   :  { %v600_v40 = vadd.f32 0.5, %v598_v60 }
  0xbf   :  { %v601_v35 = vadd.f32 0.5, %v599_v62 }
  0xc0   :  { %602 = vst [vmem:[%s1531_s2] sm:$0xff] %v600_v40 }
  0xc1   :  { %603 = vst [vmem:[%s1531_s2 + $0x8] sm:$0xff] %v601_v35 }
  0xc2   :  { %608 = vsyncpa [#allocation3], 1 }

</bundles_post_ra>
